<compile_context>
chip_gen: v7x
topology: tpu7x:2x2x1
jax: 0.10.0
libtpu: 0.0.40
codegen_flags: <defaults>
</compile_context>

<pallas_src>
import jax
import jax.numpy as jnp
from jax import lax
from jax.experimental import pallas as pl
from jax.experimental.pallas import tpu as pltpu

EPS = 1e-5


def _round_up(x, m):
    return (x + m - 1) // m * m


# ------------------------- Pallas kernels -------------------------

def _make_conv_stats_kernel(offs, n_chunks, tc, tm, hb, rp):
    """Kernel 1: 3x3 conv of the nearest-x2 upsample, evaluated at original
    resolution via the 4-sub-pixel decomposition, with fused masked
    sum / sum-of-squares for the BN batch statistics.

    In-kernel im2col: current lane tile + small right halo are staged into one
    VMEM buffer; each of the 9 taps is a static lane-offset slice of it."""

    def kernel(w_ref, xc_ref, xh_ref, m_ref, z_ref, sum_ref, sq_ref, xcat_ref):
        # Stage tile + halo contiguously (static, lane-aligned stores).
        xcat_ref[:, :tm] = xc_ref[...]
        xcat_ref[:, tm:tm + hb] = xh_ref[...]

        ws = [w_ref[t] for t in range(9)]          # 9 x (Rp, Cinp) bf16, tiny

        s_acc = jnp.zeros((rp, 1), jnp.float32)
        q_acc = jnp.zeros((rp, 1), jnp.float32)
        # Chunk the lane axis: bounds the live f32 conv value to (Rp, tc)
        # instead of (Rp, tm) -> no spill traffic on v5e's single vst slot.
        for c in range(n_chunks):
            base = c * tc
            o0 = base + offs[0]
            z = jnp.dot(ws[0], xcat_ref[:, o0:o0 + tc],
                        preferred_element_type=jnp.float32)
            for t in range(1, 9):
                o = base + offs[t]
                z = z + jnp.dot(ws[t], xcat_ref[:, o:o + tc],
                                preferred_element_type=jnp.float32)
            z_ref[:, base:base + tc] = z.astype(z_ref.dtype)     # bf16 intermediate
            m = m_ref[:, base:base + tc]                          # (1, tc) 0/1 mask
            zm = z * m
            s_acc = s_acc + jnp.sum(zm, axis=1, keepdims=True)
            q_acc = q_acc + jnp.sum(zm * z, axis=1, keepdims=True)

        # Per-tile partial stats (reduced in JAX glue) -> grid axis can stay
        # "parallel" (v7x megacore), no resident accumulator needed.
        sum_ref[0] = s_acc
        sq_ref[0] = q_acc

    return kernel


def bn_relu_kernel(z_ref, scale_ref, shift_ref, o_ref):
    """y = relu(z * scale + shift); BN already folded into scale/shift."""
    z = z_ref[...].astype(jnp.float32)
    o_ref[...] = jnp.maximum(z * scale_ref[...] + shift_ref[...], 0.0)


# ------------------------- weight glue -------------------------

def _subpixel_tap_weights(conv_w, rp, cinp):
    """(Cout, Cin, 3, 3) conv weight -> per-tap merged sub-pixel weights of
    shape (9, rp, cinp):  w_taps[ky*3+kx, co*4 + 2a + b, ci] is the weight the
    tap xpad[ci, i+ky, j+kx] contributes to output (co, 2i+a, 2j+b), where
    xpad is the ORIGINAL-resolution input zero-padded by 1."""
    Cout, Cin, _, _ = conv_w.shape
    w = conv_w.astype(jnp.float32)
    w6 = jnp.zeros((Cout, 2, 2, 3, 3, Cin), jnp.float32)   # [co, a, b, ky, kx, ci]
    for a in range(2):
        for p in range(3):
            ky = (a + p - 1) // 2 + 1        # padded-x row offset this tap reads
            for b in range(2):
                for q in range(3):
                    kx = (b + q - 1) // 2 + 1
                    w6 = w6.at[:, a, b, ky, kx, :].add(w[:, :, p, q])
    wt = jnp.transpose(w6, (3, 4, 0, 1, 2, 5)).reshape(9, 4 * Cout, Cin)
    wt = jnp.pad(wt, ((0, 0), (0, rp - 4 * Cout), (0, cinp - Cin)))
    return wt.astype(jnp.bfloat16)


# ------------------------- wrapper -------------------------

def upconv_block(x_nchw, conv_w, conv_b, bn_gamma, bn_beta, *,
                 max_tm=8192, max_tn2=8192):
    """x_nchw: (N, Cin, H, W) f32.  Returns (N, Cout, 2H, 2W) f32."""
    N, Cin, H, W = x_nchw.shape
    Cout = conv_w.shape[0]
    Wp2 = W + 2
    Sp = (H + 2) * Wp2            # padded-raster pixels per image
    Mv = N * Sp                   # total padded-raster lane positions
    M = N * H * W                 # valid output pixels at original resolution

    R = 4 * Cout                  # rows: (co, sub-pixel a, sub-pixel b)
    Rp = _round_up(R, 16)         # bf16 sublane-pair aligned
    Cinp = _round_up(Cin, 8)      # zero channel rows (16 would 2x input HBM)

    # TODO(synk): ragged last-tile support; for now the upsampled per-image
    # plane must tile cleanly into 128 lanes.
    assert (4 * H * W) % 128 == 0, "requires H*W % 32 == 0"

    # --- lane tiling of the padded raster (tile + right halo per grid step)
    halo = 2 * Wp2 + 2                               # largest tap offset
    hb = _round_up(halo, 128)                        # halo block (128-aligned)
    tm = min(max_tm, _round_up(Mv, hb))
    tm = max(hb, (tm // hb) * hb)                    # multiple of hb (and 128)
    G = -(-Mv // tm)                                 # ceil
    Mg = G * tm                                      # lanes kernel 1 covers
    Min = Mg + tm                                    # + zero block so the halo
                                                     #   spec never reads OOB
    tc = next(c for c in (512, 256, 128) if tm % c == 0)
    n_chunks = tm // tc

    # --- input: channel-major, spatially zero-padded, flattened, bf16
    xb = x_nchw.astype(jnp.bfloat16)
    xc = jnp.transpose(xb, (1, 0, 2, 3))                          # (Cin,N,H,W)
    xp = jnp.pad(xc, ((0, Cinp - Cin), (0, 0), (1, 1), (1, 1)))   # (Cinp,N,H+2,W+2)
    x_flat = jnp.pad(xp.reshape(Cinp, Mv), ((0, 0), (0, Min - Mv)))

    # --- 0/1 validity mask over the padded raster (base is a real pixel iff
    #     padded-row < H and padded-col < W); also zeroes the tail padding.
    idx = jnp.arange(Mg, dtype=jnp.int32)
    rr = (idx % Sp) // Wp2
    cc = idx % Wp2
    mask = ((rr < H) & (cc < W) & (idx < Mv)).astype(jnp.float32).reshape(1, Mg)

    # --- merged sub-pixel weights, one (Rp, Cinp) matrix per tap
    w_taps = _subpixel_tap_weights(conv_w, Rp, Cinp)              # (9,Rp,Cinp) bf16
    offs = tuple(ky * Wp2 + kx for ky in range(3) for kx in range(3))

    # Conv bias is a mathematical no-op under training-mode BN (shifts the
    # batch mean by the same constant, leaves var unchanged) -> dropped.
    del conv_b

    # Explicit VMEM limit: safe on v5e (16 MiB scoped default) and leaves
    # headroom on v7x (64 MiB physical); per-step usage here is ~1.5 MB.
    cp1 = pltpu.CompilerParams(dimension_semantics=("parallel",),
                               vmem_limit_bytes=32 * 1024 * 1024)
    cp2 = pltpu.CompilerParams(dimension_semantics=("parallel",),
                               vmem_limit_bytes=32 * 1024 * 1024)

    # --- kernel 1: fused (upsample+conv) with in-kernel im2col + BN stats
    kernel1 = _make_conv_stats_kernel(offs, n_chunks, tc, tm, hb, Rp)
    zt, psum, psq = pl.pallas_call(
        kernel1,
        out_shape=(
            jax.ShapeDtypeStruct((Rp, Mg), jnp.bfloat16),
            jax.ShapeDtypeStruct((G, Rp, 1), jnp.float32),
            jax.ShapeDtypeStruct((G, Rp, 1), jnp.float32),
        ),
        grid_spec=pltpu.PrefetchScalarGridSpec(
            num_scalar_prefetch=0,
            grid=(G,),
            in_specs=[
                pl.BlockSpec((9, Rp, Cinp), lambda i: (0, 0, 0)),   # weights, resident
                pl.BlockSpec((Cinp, tm), lambda i: (0, i)),         # current tile
                pl.BlockSpec((Cinp, hb),                            # right halo
                             lambda i: (0, (i + 1) * (tm // hb))),
                pl.BlockSpec((1, tm), lambda i: (0, i)),            # validity mask
            ],
            out_specs=[
                pl.BlockSpec((Rp, tm), lambda i: (0, i)),
                pl.BlockSpec((1, Rp, 1), lambda i: (i, 0, 0)),
                pl.BlockSpec((1, Rp, 1), lambda i: (i, 0, 0)),
            ],
            scratch_shapes=[pltpu.VMEM((Cinp, tm + hb), jnp.bfloat16)],
        ),
        compiler_params=cp1,
    )(w_taps, x_flat, x_flat, mask)

    # --- tiny glue: partial stats -> folded per-channel scale/shift
    n_elem = jnp.float32(4 * M)                       # = N * 2H * 2W
    row_sum = jnp.sum(psum, axis=0)[:R, 0]            # (R,)
    row_sq = jnp.sum(psq, axis=0)[:R, 0]
    ch_sum = row_sum.reshape(Cout, 4).sum(axis=1)
    ch_sq = row_sq.reshape(Cout, 4).sum(axis=1)
    mean = ch_sum / n_elem
    # TODO(synk): E[z^2]-E[z]^2 can cancel when |mean| >> std; a shifted /
    # centered second-moment pass would be more robust.  Clamp keeps var >= 0.
    var = jnp.maximum(ch_sq / n_elem - mean * mean, 0.0)
    scale = bn_gamma.astype(jnp.float32) * lax.rsqrt(var + EPS)
    shift = bn_beta.astype(jnp.float32) - mean * scale

    # --- pixel-shuffle on the *bf16* intermediate, BEFORE the BN/ReLU kernel,
    # so the large f32 result is written exactly once, already NCHW-ordered.
    # TODO(synk): this bf16 transpose is still an XLA pass; a fully in-kernel
    # shuffle would need a strided lane scatter not expressible via BlockSpec.
    zv = zt[:R, :Mv].reshape(Cout, 2, 2, N, H + 2, Wp2)[:, :, :, :, :H, :W]
    z_nchw = jnp.transpose(zv, (3, 0, 4, 1, 5, 2)).reshape(N * Cout, 4 * H * W)

    # --- kernel 2: lane-dense scale/shift + ReLU, output in final layout
    NC = N * Cout
    L = 4 * H * W
    row_scale = jnp.tile(scale, N).reshape(NC, 1)
    row_shift = jnp.tile(shift, N).reshape(NC, 1)

    tn2, t, budget = 128, 128, 24 * 1024 * 1024
    while t <= min(max_tn2, L):
        if L % t == 0 and NC * t * 12 <= budget:
            tn2 = t
        t += 128

    y2 = pl.pallas_call(
        bn_relu_kernel,
        out_shape=jax.ShapeDtypeStruct((NC, L), jnp.float32),
        grid_spec=pltpu.PrefetchScalarGridSpec(
            num_scalar_prefetch=0,
            grid=(L // tn2,),
            in_specs=[
                pl.BlockSpec((NC, tn2), lambda j: (0, j)),
                pl.BlockSpec((NC, 1), lambda j: (0, 0)),
                pl.BlockSpec((NC, 1), lambda j: (0, 0)),
            ],
            out_specs=pl.BlockSpec((NC, tn2), lambda j: (0, j)),
        ),
        compiler_params=cp2,
    )(z_nchw, row_scale, row_shift)

    # Pure-metadata reshape: no further HBM pass over the f32 output.
    return y2.reshape(N, Cout, 2 * H, 2 * W)


# ------------------------- reference (pure JAX) -------------------------

def _reference(x, conv_w, conv_b, gamma, beta):
    up = jnp.repeat(jnp.repeat(x, 2, axis=2), 2, axis=3)            # nearest x2
    conv = lax.conv_general_dilated(
        up, conv_w, window_strides=(1, 1), padding=((1, 1), (1, 1)),
        dimension_numbers=("NCHW", "OIHW", "NCHW"))
    conv = conv + conv_b[None, :, None, None]
    mean = conv.mean(axis=(0, 2, 3), keepdims=True)
    var = conv.var(axis=(0, 2, 3), keepdims=True)                   # biased
    y = (conv - mean) * lax.rsqrt(var + EPS)
    y = y * gamma[None, :, None, None] + beta[None, :, None, None]
    return jnp.maximum(y, 0.0)


# ------------------------- demo -------------------------

if __name__ == "__main__":
    key = jax.random.PRNGKey(0)
    k_x, k_w, k_b, k_g, k_be = jax.random.split(key, 5)

    N, Cin, Cout, H, W = 2, 4, 8, 16, 16          # output spatial = 32x32

    x = jax.random.normal(k_x, (N, Cin, H, W), jnp.float32)
    fan_in = Cin * 3 * 3
    conv_w = jax.random.normal(k_w, (Cout, Cin, 3, 3), jnp.float32) / jnp.sqrt(fan_in)
    conv_b = 0.1 * jax.random.normal(k_b, (Cout,), jnp.float32)
    bn_gamma = 1.0 + 0.1 * jax.random.normal(k_g, (Cout,), jnp.float32)
    bn_beta = 0.1 * jax.random.normal(k_be, (Cout,), jnp.float32)

    out = jax.block_until_ready(upconv_block(x, conv_w, conv_b, bn_gamma, bn_beta))

    assert out.shape == (N, Cout, 2 * H, 2 * W), out.shape
    assert bool(jnp.all(jnp.isfinite(out))) and bool(jnp.all(out >= 0.0))

    ref = _reference(x, conv_w, conv_b, bn_gamma, bn_beta)
    err = float(jnp.max(jnp.abs(out - ref)))
    assert err < 1e-1, f"max abs err vs reference: {err}"

    print("KERNEL_OK")
</pallas_src>

<mosaic_0001>
module attributes {stable_mosaic.version = 11 : i64} {
  func.func @kernel(%arg0: i32, %arg1: memref<9x32x8xbf16, #tpu.memory_space<vmem>>, %arg2: memref<8x768xbf16, #tpu.memory_space<vmem>>, %arg3: memref<8x128xbf16, #tpu.memory_space<vmem>>, %arg4: memref<1x768xf32, #tpu.memory_space<vmem>>, %arg5: memref<32x768xbf16, #tpu.memory_space<vmem>>, %arg6: memref<1x32x1xf32, #tpu.memory_space<vmem>>, %arg7: memref<1x32x1xf32, #tpu.memory_space<vmem>>, %arg8: memref<8x896xbf16, #tpu.memory_space<vmem>>) attributes {dimension_semantics = [#tpu.dimension_semantics<parallel>], iteration_bounds = array<i64: 1>, scalar_prefetch = 0 : i64, scratch_operands = 1 : i64, tpu.core_type = #tpu.core_type<tc>, window_params = [{pipeline_mode = #tpu.pipeline_mode<synchronous>, transform_indices = @transform_0, window_bounds = array<i64: 9, 32, 8>}, {transform_indices = @transform_1, window_bounds = array<i64: 8, 768>}, {transform_indices = @transform_2, window_bounds = array<i64: 8, 128>}, {transform_indices = @transform_3, window_bounds = array<i64: 1, 768>}, {transform_indices = @transform_4, window_bounds = array<i64: 32, 768>}, {transform_indices = @transform_5, window_bounds = array<i64: 1, 32, 1>}, {transform_indices = @transform_6, window_bounds = array<i64: 1, 32, 1>}]} {
    %c0 = arith.constant 0 : index
    %c0_0 = arith.constant 0 : index
    %0 = vector.load %arg2[%c0, %c0_0] : memref<8x768xbf16, #tpu.memory_space<vmem>>, vector<8x768xbf16>
    %c0_1 = arith.constant 0 : index
    %c0_2 = arith.constant 0 : index
    %1 = vector.load %arg8[%c0_1, %c0_2] : memref<8x896xbf16, #tpu.memory_space<vmem>>, vector<8x768xbf16>
    tpu.vector_store %arg8[%c0_1, %c0_2], %0 {strides = array<i32>} : memref<8x896xbf16, #tpu.memory_space<vmem>>, vector<8x768xbf16>,
    %c0_3 = arith.constant 0 : index
    %c0_4 = arith.constant 0 : index
    %2 = vector.load %arg3[%c0_3, %c0_4] : memref<8x128xbf16, #tpu.memory_space<vmem>>, vector<8x128xbf16>
    %c0_5 = arith.constant 0 : index
    %c768 = arith.constant 768 : index
    %3 = vector.load %arg8[%c0_5, %c768] : memref<8x896xbf16, #tpu.memory_space<vmem>>, vector<8x128xbf16>
    tpu.vector_store %arg8[%c0_5, %c768], %2 {strides = array<i32>} : memref<8x896xbf16, #tpu.memory_space<vmem>>, vector<8x128xbf16>,
    %c0_6 = arith.constant 0 : index
    %c0_7 = arith.constant 0 : index
    %c0_8 = arith.constant 0 : index
    %4 = vector.load %arg1[%c0_6, %c0_7, %c0_8] : memref<9x32x8xbf16, #tpu.memory_space<vmem>>, vector<1x32x8xbf16>
    %5 = vector.shape_cast %4 : vector<1x32x8xbf16> to vector<32x8xbf16>
    %c1 = arith.constant 1 : index
    %c0_9 = arith.constant 0 : index
    %c0_10 = arith.constant 0 : index
    %6 = vector.load %arg1[%c1, %c0_9, %c0_10] : memref<9x32x8xbf16, #tpu.memory_space<vmem>>, vector<1x32x8xbf16>
    %7 = vector.shape_cast %6 : vector<1x32x8xbf16> to vector<32x8xbf16>
    %c2 = arith.constant 2 : index
    %c0_11 = arith.constant 0 : index
    %c0_12 = arith.constant 0 : index
    %8 = vector.load %arg1[%c2, %c0_11, %c0_12] : memref<9x32x8xbf16, #tpu.memory_space<vmem>>, vector<1x32x8xbf16>
    %9 = vector.shape_cast %8 : vector<1x32x8xbf16> to vector<32x8xbf16>
    %c3 = arith.constant 3 : index
    %c0_13 = arith.constant 0 : index
    %c0_14 = arith.constant 0 : index
    %10 = vector.load %arg1[%c3, %c0_13, %c0_14] : memref<9x32x8xbf16, #tpu.memory_space<vmem>>, vector<1x32x8xbf16>
    %11 = vector.shape_cast %10 : vector<1x32x8xbf16> to vector<32x8xbf16>
    %c4 = arith.constant 4 : index
    %c0_15 = arith.constant 0 : index
    %c0_16 = arith.constant 0 : index
    %12 = vector.load %arg1[%c4, %c0_15, %c0_16] : memref<9x32x8xbf16, #tpu.memory_space<vmem>>, vector<1x32x8xbf16>
    %13 = vector.shape_cast %12 : vector<1x32x8xbf16> to vector<32x8xbf16>
    %c5 = arith.constant 5 : index
    %c0_17 = arith.constant 0 : index
    %c0_18 = arith.constant 0 : index
    %14 = vector.load %arg1[%c5, %c0_17, %c0_18] : memref<9x32x8xbf16, #tpu.memory_space<vmem>>, vector<1x32x8xbf16>
    %15 = vector.shape_cast %14 : vector<1x32x8xbf16> to vector<32x8xbf16>
    %c6 = arith.constant 6 : index
    %c0_19 = arith.constant 0 : index
    %c0_20 = arith.constant 0 : index
    %16 = vector.load %arg1[%c6, %c0_19, %c0_20] : memref<9x32x8xbf16, #tpu.memory_space<vmem>>, vector<1x32x8xbf16>
    %17 = vector.shape_cast %16 : vector<1x32x8xbf16> to vector<32x8xbf16>
    %c7 = arith.constant 7 : index
    %c0_21 = arith.constant 0 : index
    %c0_22 = arith.constant 0 : index
    %18 = vector.load %arg1[%c7, %c0_21, %c0_22] : memref<9x32x8xbf16, #tpu.memory_space<vmem>>, vector<1x32x8xbf16>
    %19 = vector.shape_cast %18 : vector<1x32x8xbf16> to vector<32x8xbf16>
    %c8 = arith.constant 8 : index
    %c0_23 = arith.constant 0 : index
    %c0_24 = arith.constant 0 : index
    %20 = vector.load %arg1[%c8, %c0_23, %c0_24] : memref<9x32x8xbf16, #tpu.memory_space<vmem>>, vector<1x32x8xbf16>
    %21 = vector.shape_cast %20 : vector<1x32x8xbf16> to vector<32x8xbf16>
    %cst = arith.constant 0.000000e+00 : f32
    %22 = vector.broadcast %cst : f32 to vector<32x1xf32>
    %cst_25 = arith.constant 0.000000e+00 : f32
    %23 = vector.broadcast %cst_25 : f32 to vector<32x1xf32>
    %c0_26 = arith.constant 0 : index
    %c0_27 = arith.constant 0 : index
    %24 = vector.load %arg8[%c0_26, %c0_27] : memref<8x896xbf16, #tpu.memory_space<vmem>>, vector<8x256xbf16>
    %cst_28 = arith.constant dense<0.000000e+00> : vector<32x256xf32>
    %25 = tpu.matmul %5, %24, %cst_28 {dimension_numbers = #tpu.dot_dimension_numbers<[1], [0], [0], [1], [0, 0, 1, 1], [], []>} : vector<32x8xbf16>, vector<8x256xbf16>, vector<32x256xf32> -> vector<32x256xf32>
    %c0_29 = arith.constant 0 : index
    %c1_30 = arith.constant 1 : index
    %26 = vector.load %arg8[%c0_29, %c1_30] : memref<8x896xbf16, #tpu.memory_space<vmem>>, vector<8x256xbf16>
    %cst_31 = arith.constant dense<0.000000e+00> : vector<32x256xf32>
    %27 = tpu.matmul %7, %26, %cst_31 {dimension_numbers = #tpu.dot_dimension_numbers<[1], [0], [0], [1], [0, 0, 1, 1], [], []>} : vector<32x8xbf16>, vector<8x256xbf16>, vector<32x256xf32> -> vector<32x256xf32>
    %28 = arith.addf %25, %27 : vector<32x256xf32>
    %c0_32 = arith.constant 0 : index
    %c2_33 = arith.constant 2 : index
    %29 = vector.load %arg8[%c0_32, %c2_33] : memref<8x896xbf16, #tpu.memory_space<vmem>>, vector<8x256xbf16>
    %cst_34 = arith.constant dense<0.000000e+00> : vector<32x256xf32>
    %30 = tpu.matmul %9, %29, %cst_34 {dimension_numbers = #tpu.dot_dimension_numbers<[1], [0], [0], [1], [0, 0, 1, 1], [], []>} : vector<32x8xbf16>, vector<8x256xbf16>, vector<32x256xf32> -> vector<32x256xf32>
    %31 = arith.addf %28, %30 : vector<32x256xf32>
    %c0_35 = arith.constant 0 : index
    %c18 = arith.constant 18 : index
    %32 = vector.load %arg8[%c0_35, %c18] : memref<8x896xbf16, #tpu.memory_space<vmem>>, vector<8x256xbf16>
    %cst_36 = arith.constant dense<0.000000e+00> : vector<32x256xf32>
    %33 = tpu.matmul %11, %32, %cst_36 {dimension_numbers = #tpu.dot_dimension_numbers<[1], [0], [0], [1], [0, 0, 1, 1], [], []>} : vector<32x8xbf16>, vector<8x256xbf16>, vector<32x256xf32> -> vector<32x256xf32>
    %34 = arith.addf %31, %33 : vector<32x256xf32>
    %c0_37 = arith.constant 0 : index
    %c19 = arith.constant 19 : index
    %35 = vector.load %arg8[%c0_37, %c19] : memref<8x896xbf16, #tpu.memory_space<vmem>>, vector<8x256xbf16>
    %cst_38 = arith.constant dense<0.000000e+00> : vector<32x256xf32>
    %36 = tpu.matmul %13, %35, %cst_38 {dimension_numbers = #tpu.dot_dimension_numbers<[1], [0], [0], [1], [0, 0, 1, 1], [], []>} : vector<32x8xbf16>, vector<8x256xbf16>, vector<32x256xf32> -> vector<32x256xf32>
    %37 = arith.addf %34, %36 : vector<32x256xf32>
    %c0_39 = arith.constant 0 : index
    %c20 = arith.constant 20 : index
    %38 = vector.load %arg8[%c0_39, %c20] : memref<8x896xbf16, #tpu.memory_space<vmem>>, vector<8x256xbf16>
    %cst_40 = arith.constant dense<0.000000e+00> : vector<32x256xf32>
    %39 = tpu.matmul %15, %38, %cst_40 {dimension_numbers = #tpu.dot_dimension_numbers<[1], [0], [0], [1], [0, 0, 1, 1], [], []>} : vector<32x8xbf16>, vector<8x256xbf16>, vector<32x256xf32> -> vector<32x256xf32>
    %40 = arith.addf %37, %39 : vector<32x256xf32>
    %c0_41 = arith.constant 0 : index
    %c36 = arith.constant 36 : index
    %41 = vector.load %arg8[%c0_41, %c36] : memref<8x896xbf16, #tpu.memory_space<vmem>>, vector<8x256xbf16>
    %cst_42 = arith.constant dense<0.000000e+00> : vector<32x256xf32>
    %42 = tpu.matmul %17, %41, %cst_42 {dimension_numbers = #tpu.dot_dimension_numbers<[1], [0], [0], [1], [0, 0, 1, 1], [], []>} : vector<32x8xbf16>, vector<8x256xbf16>, vector<32x256xf32> -> vector<32x256xf32>
    %43 = arith.addf %40, %42 : vector<32x256xf32>
    %c0_43 = arith.constant 0 : index
    %c37 = arith.constant 37 : index
    %44 = vector.load %arg8[%c0_43, %c37] : memref<8x896xbf16, #tpu.memory_space<vmem>>, vector<8x256xbf16>
    %cst_44 = arith.constant dense<0.000000e+00> : vector<32x256xf32>
    %45 = tpu.matmul %19, %44, %cst_44 {dimension_numbers = #tpu.dot_dimension_numbers<[1], [0], [0], [1], [0, 0, 1, 1], [], []>} : vector<32x8xbf16>, vector<8x256xbf16>, vector<32x256xf32> -> vector<32x256xf32>
    %46 = arith.addf %43, %45 : vector<32x256xf32>
    %c0_45 = arith.constant 0 : index
    %c38 = arith.constant 38 : index
    %47 = vector.load %arg8[%c0_45, %c38] : memref<8x896xbf16, #tpu.memory_space<vmem>>, vector<8x256xbf16>
    %cst_46 = arith.constant dense<0.000000e+00> : vector<32x256xf32>
    %48 = tpu.matmul %21, %47, %cst_46 {dimension_numbers = #tpu.dot_dimension_numbers<[1], [0], [0], [1], [0, 0, 1, 1], [], []>} : vector<32x8xbf16>, vector<8x256xbf16>, vector<32x256xf32> -> vector<32x256xf32>
    %49 = arith.addf %46, %48 : vector<32x256xf32>
    %50 = arith.truncf %49 : vector<32x256xf32> to vector<32x256xbf16>
    %c0_47 = arith.constant 0 : index
    %c0_48 = arith.constant 0 : index
    %51 = vector.load %arg5[%c0_47, %c0_48] : memref<32x768xbf16, #tpu.memory_space<vmem>>, vector<32x256xbf16>
    tpu.vector_store %arg5[%c0_47, %c0_48], %50 {strides = array<i32>} : memref<32x768xbf16, #tpu.memory_space<vmem>>, vector<32x256xbf16>,
    %c0_49 = arith.constant 0 : index
    %c0_50 = arith.constant 0 : index
    %52 = vector.load %arg4[%c0_49, %c0_50] : memref<1x768xf32, #tpu.memory_space<vmem>>, vector<1x256xf32>
    %53 = vector.broadcast %52 : vector<1x256xf32> to vector<32x256xf32>
    %54 = arith.mulf %49, %53 : vector<32x256xf32>
    %cst_51 = arith.constant dense<0.000000e+00> : vector<32xf32>
    %55 = vector.multi_reduction <add>, %54, %cst_51 [1] : vector<32x256xf32> to vector<32xf32>
    %56 = vector.shape_cast %55 : vector<32xf32> to vector<32x1xf32>
    %57 = arith.addf %22, %56 : vector<32x1xf32>
    %58 = arith.mulf %54, %49 : vector<32x256xf32>
    %cst_52 = arith.constant dense<0.000000e+00> : vector<32xf32>
    %59 = vector.multi_reduction <add>, %58, %cst_52 [1] : vector<32x256xf32> to vector<32xf32>
    %60 = vector.shape_cast %59 : vector<32xf32> to vector<32x1xf32>
    %61 = arith.addf %23, %60 : vector<32x1xf32>
    %c0_53 = arith.constant 0 : index
    %c256 = arith.constant 256 : index
    %62 = vector.load %arg8[%c0_53, %c256] : memref<8x896xbf16, #tpu.memory_space<vmem>>, vector<8x256xbf16>
    %cst_54 = arith.constant dense<0.000000e+00> : vector<32x256xf32>
    %63 = tpu.matmul %5, %62, %cst_54 {dimension_numbers = #tpu.dot_dimension_numbers<[1], [0], [0], [1], [0, 0, 1, 1], [], []>} : vector<32x8xbf16>, vector<8x256xbf16>, vector<32x256xf32> -> vector<32x256xf32>
    %c0_55 = arith.constant 0 : index
    %c257 = arith.constant 257 : index
    %64 = vector.load %arg8[%c0_55, %c257] : memref<8x896xbf16, #tpu.memory_space<vmem>>, vector<8x256xbf16>
    %cst_56 = arith.constant dense<0.000000e+00> : vector<32x256xf32>
    %65 = tpu.matmul %7, %64, %cst_56 {dimension_numbers = #tpu.dot_dimension_numbers<[1], [0], [0], [1], [0, 0, 1, 1], [], []>} : vector<32x8xbf16>, vector<8x256xbf16>, vector<32x256xf32> -> vector<32x256xf32>
    %66 = arith.addf %63, %65 : vector<32x256xf32>
    %c0_57 = arith.constant 0 : index
    %c258 = arith.constant 258 : index
    %67 = vector.load %arg8[%c0_57, %c258] : memref<8x896xbf16, #tpu.memory_space<vmem>>, vector<8x256xbf16>
    %cst_58 = arith.constant dense<0.000000e+00> : vector<32x256xf32>
    %68 = tpu.matmul %9, %67, %cst_58 {dimension_numbers = #tpu.dot_dimension_numbers<[1], [0], [0], [1], [0, 0, 1, 1], [], []>} : vector<32x8xbf16>, vector<8x256xbf16>, vector<32x256xf32> -> vector<32x256xf32>
    %69 = arith.addf %66, %68 : vector<32x256xf32>
    %c0_59 = arith.constant 0 : index
    %c274 = arith.constant 274 : index
    %70 = vector.load %arg8[%c0_59, %c274] : memref<8x896xbf16, #tpu.memory_space<vmem>>, vector<8x256xbf16>
    %cst_60 = arith.constant dense<0.000000e+00> : vector<32x256xf32>
    %71 = tpu.matmul %11, %70, %cst_60 {dimension_numbers = #tpu.dot_dimension_numbers<[1], [0], [0], [1], [0, 0, 1, 1], [], []>} : vector<32x8xbf16>, vector<8x256xbf16>, vector<32x256xf32> -> vector<32x256xf32>
    %72 = arith.addf %69, %71 : vector<32x256xf32>
    %c0_61 = arith.constant 0 : index
    %c275 = arith.constant 275 : index
    %73 = vector.load %arg8[%c0_61, %c275] : memref<8x896xbf16, #tpu.memory_space<vmem>>, vector<8x256xbf16>
    %cst_62 = arith.constant dense<0.000000e+00> : vector<32x256xf32>
    %74 = tpu.matmul %13, %73, %cst_62 {dimension_numbers = #tpu.dot_dimension_numbers<[1], [0], [0], [1], [0, 0, 1, 1], [], []>} : vector<32x8xbf16>, vector<8x256xbf16>, vector<32x256xf32> -> vector<32x256xf32>
    %75 = arith.addf %72, %74 : vector<32x256xf32>
    %c0_63 = arith.constant 0 : index
    %c276 = arith.constant 276 : index
    %76 = vector.load %arg8[%c0_63, %c276] : memref<8x896xbf16, #tpu.memory_space<vmem>>, vector<8x256xbf16>
    %cst_64 = arith.constant dense<0.000000e+00> : vector<32x256xf32>
    %77 = tpu.matmul %15, %76, %cst_64 {dimension_numbers = #tpu.dot_dimension_numbers<[1], [0], [0], [1], [0, 0, 1, 1], [], []>} : vector<32x8xbf16>, vector<8x256xbf16>, vector<32x256xf32> -> vector<32x256xf32>
    %78 = arith.addf %75, %77 : vector<32x256xf32>
    %c0_65 = arith.constant 0 : index
    %c292 = arith.constant 292 : index
    %79 = vector.load %arg8[%c0_65, %c292] : memref<8x896xbf16, #tpu.memory_space<vmem>>, vector<8x256xbf16>
    %cst_66 = arith.constant dense<0.000000e+00> : vector<32x256xf32>
    %80 = tpu.matmul %17, %79, %cst_66 {dimension_numbers = #tpu.dot_dimension_numbers<[1], [0], [0], [1], [0, 0, 1, 1], [], []>} : vector<32x8xbf16>, vector<8x256xbf16>, vector<32x256xf32> -> vector<32x256xf32>
    %81 = arith.addf %78, %80 : vector<32x256xf32>
    %c0_67 = arith.constant 0 : index
    %c293 = arith.constant 293 : index
    %82 = vector.load %arg8[%c0_67, %c293] : memref<8x896xbf16, #tpu.memory_space<vmem>>, vector<8x256xbf16>
    %cst_68 = arith.constant dense<0.000000e+00> : vector<32x256xf32>
    %83 = tpu.matmul %19, %82, %cst_68 {dimension_numbers = #tpu.dot_dimension_numbers<[1], [0], [0], [1], [0, 0, 1, 1], [], []>} : vector<32x8xbf16>, vector<8x256xbf16>, vector<32x256xf32> -> vector<32x256xf32>
    %84 = arith.addf %81, %83 : vector<32x256xf32>
    %c0_69 = arith.constant 0 : index
    %c294 = arith.constant 294 : index
    %85 = vector.load %arg8[%c0_69, %c294] : memref<8x896xbf16, #tpu.memory_space<vmem>>, vector<8x256xbf16>
    %cst_70 = arith.constant dense<0.000000e+00> : vector<32x256xf32>
    %86 = tpu.matmul %21, %85, %cst_70 {dimension_numbers = #tpu.dot_dimension_numbers<[1], [0], [0], [1], [0, 0, 1, 1], [], []>} : vector<32x8xbf16>, vector<8x256xbf16>, vector<32x256xf32> -> vector<32x256xf32>
    %87 = arith.addf %84, %86 : vector<32x256xf32>
    %88 = arith.truncf %87 : vector<32x256xf32> to vector<32x256xbf16>
    %c0_71 = arith.constant 0 : index
    %c256_72 = arith.constant 256 : index
    %89 = vector.load %arg5[%c0_71, %c256_72] : memref<32x768xbf16, #tpu.memory_space<vmem>>, vector<32x256xbf16>
    tpu.vector_store %arg5[%c0_71, %c256_72], %88 {strides = array<i32>} : memref<32x768xbf16, #tpu.memory_space<vmem>>, vector<32x256xbf16>,
    %c0_73 = arith.constant 0 : index
    %c256_74 = arith.constant 256 : index
    %90 = vector.load %arg4[%c0_73, %c256_74] : memref<1x768xf32, #tpu.memory_space<vmem>>, vector<1x256xf32>
    %91 = vector.broadcast %90 : vector<1x256xf32> to vector<32x256xf32>
    %92 = arith.mulf %87, %91 : vector<32x256xf32>
    %cst_75 = arith.constant dense<0.000000e+00> : vector<32xf32>
    %93 = vector.multi_reduction <add>, %92, %cst_75 [1] : vector<32x256xf32> to vector<32xf32>
    %94 = vector.shape_cast %93 : vector<32xf32> to vector<32x1xf32>
    %95 = arith.addf %57, %94 : vector<32x1xf32>
    %96 = arith.mulf %92, %87 : vector<32x256xf32>
    %cst_76 = arith.constant dense<0.000000e+00> : vector<32xf32>
    %97 = vector.multi_reduction <add>, %96, %cst_76 [1] : vector<32x256xf32> to vector<32xf32>
    %98 = vector.shape_cast %97 : vector<32xf32> to vector<32x1xf32>
    %99 = arith.addf %61, %98 : vector<32x1xf32>
    %c0_77 = arith.constant 0 : index
    %c512 = arith.constant 512 : index
    %100 = vector.load %arg8[%c0_77, %c512] : memref<8x896xbf16, #tpu.memory_space<vmem>>, vector<8x256xbf16>
    %cst_78 = arith.constant dense<0.000000e+00> : vector<32x256xf32>
    %101 = tpu.matmul %5, %100, %cst_78 {dimension_numbers = #tpu.dot_dimension_numbers<[1], [0], [0], [1], [0, 0, 1, 1], [], []>} : vector<32x8xbf16>, vector<8x256xbf16>, vector<32x256xf32> -> vector<32x256xf32>
    %c0_79 = arith.constant 0 : index
    %c513 = arith.constant 513 : index
    %102 = vector.load %arg8[%c0_79, %c513] : memref<8x896xbf16, #tpu.memory_space<vmem>>, vector<8x256xbf16>
    %cst_80 = arith.constant dense<0.000000e+00> : vector<32x256xf32>
    %103 = tpu.matmul %7, %102, %cst_80 {dimension_numbers = #tpu.dot_dimension_numbers<[1], [0], [0], [1], [0, 0, 1, 1], [], []>} : vector<32x8xbf16>, vector<8x256xbf16>, vector<32x256xf32> -> vector<32x256xf32>
    %104 = arith.addf %101, %103 : vector<32x256xf32>
    %c0_81 = arith.constant 0 : index
    %c514 = arith.constant 514 : index
    %105 = vector.load %arg8[%c0_81, %c514] : memref<8x896xbf16, #tpu.memory_space<vmem>>, vector<8x256xbf16>
    %cst_82 = arith.constant dense<0.000000e+00> : vector<32x256xf32>
    %106 = tpu.matmul %9, %105, %cst_82 {dimension_numbers = #tpu.dot_dimension_numbers<[1], [0], [0], [1], [0, 0, 1, 1], [], []>} : vector<32x8xbf16>, vector<8x256xbf16>, vector<32x256xf32> -> vector<32x256xf32>
    %107 = arith.addf %104, %106 : vector<32x256xf32>
    %c0_83 = arith.constant 0 : index
    %c530 = arith.constant 530 : index
    %108 = vector.load %arg8[%c0_83, %c530] : memref<8x896xbf16, #tpu.memory_space<vmem>>, vector<8x256xbf16>
    %cst_84 = arith.constant dense<0.000000e+00> : vector<32x256xf32>
    %109 = tpu.matmul %11, %108, %cst_84 {dimension_numbers = #tpu.dot_dimension_numbers<[1], [0], [0], [1], [0, 0, 1, 1], [], []>} : vector<32x8xbf16>, vector<8x256xbf16>, vector<32x256xf32> -> vector<32x256xf32>
    %110 = arith.addf %107, %109 : vector<32x256xf32>
    %c0_85 = arith.constant 0 : index
    %c531 = arith.constant 531 : index
    %111 = vector.load %arg8[%c0_85, %c531] : memref<8x896xbf16, #tpu.memory_space<vmem>>, vector<8x256xbf16>
    %cst_86 = arith.constant dense<0.000000e+00> : vector<32x256xf32>
    %112 = tpu.matmul %13, %111, %cst_86 {dimension_numbers = #tpu.dot_dimension_numbers<[1], [0], [0], [1], [0, 0, 1, 1], [], []>} : vector<32x8xbf16>, vector<8x256xbf16>, vector<32x256xf32> -> vector<32x256xf32>
    %113 = arith.addf %110, %112 : vector<32x256xf32>
    %c0_87 = arith.constant 0 : index
    %c532 = arith.constant 532 : index
    %114 = vector.load %arg8[%c0_87, %c532] : memref<8x896xbf16, #tpu.memory_space<vmem>>, vector<8x256xbf16>
    %cst_88 = arith.constant dense<0.000000e+00> : vector<32x256xf32>
    %115 = tpu.matmul %15, %114, %cst_88 {dimension_numbers = #tpu.dot_dimension_numbers<[1], [0], [0], [1], [0, 0, 1, 1], [], []>} : vector<32x8xbf16>, vector<8x256xbf16>, vector<32x256xf32> -> vector<32x256xf32>
    %116 = arith.addf %113, %115 : vector<32x256xf32>
    %c0_89 = arith.constant 0 : index
    %c548 = arith.constant 548 : index
    %117 = vector.load %arg8[%c0_89, %c548] : memref<8x896xbf16, #tpu.memory_space<vmem>>, vector<8x256xbf16>
    %cst_90 = arith.constant dense<0.000000e+00> : vector<32x256xf32>
    %118 = tpu.matmul %17, %117, %cst_90 {dimension_numbers = #tpu.dot_dimension_numbers<[1], [0], [0], [1], [0, 0, 1, 1], [], []>} : vector<32x8xbf16>, vector<8x256xbf16>, vector<32x256xf32> -> vector<32x256xf32>
    %119 = arith.addf %116, %118 : vector<32x256xf32>
    %c0_91 = arith.constant 0 : index
    %c549 = arith.constant 549 : index
    %120 = vector.load %arg8[%c0_91, %c549] : memref<8x896xbf16, #tpu.memory_space<vmem>>, vector<8x256xbf16>
    %cst_92 = arith.constant dense<0.000000e+00> : vector<32x256xf32>
    %121 = tpu.matmul %19, %120, %cst_92 {dimension_numbers = #tpu.dot_dimension_numbers<[1], [0], [0], [1], [0, 0, 1, 1], [], []>} : vector<32x8xbf16>, vector<8x256xbf16>, vector<32x256xf32> -> vector<32x256xf32>
    %122 = arith.addf %119, %121 : vector<32x256xf32>
    %c0_93 = arith.constant 0 : index
    %c550 = arith.constant 550 : index
    %123 = vector.load %arg8[%c0_93, %c550] : memref<8x896xbf16, #tpu.memory_space<vmem>>, vector<8x256xbf16>
    %cst_94 = arith.constant dense<0.000000e+00> : vector<32x256xf32>
    %124 = tpu.matmul %21, %123, %cst_94 {dimension_numbers = #tpu.dot_dimension_numbers<[1], [0], [0], [1], [0, 0, 1, 1], [], []>} : vector<32x8xbf16>, vector<8x256xbf16>, vector<32x256xf32> -> vector<32x256xf32>
    %125 = arith.addf %122, %124 : vector<32x256xf32>
    %126 = arith.truncf %125 : vector<32x256xf32> to vector<32x256xbf16>
    %c0_95 = arith.constant 0 : index
    %c512_96 = arith.constant 512 : index
    %127 = vector.load %arg5[%c0_95, %c512_96] : memref<32x768xbf16, #tpu.memory_space<vmem>>, vector<32x256xbf16>
    tpu.vector_store %arg5[%c0_95, %c512_96], %126 {strides = array<i32>} : memref<32x768xbf16, #tpu.memory_space<vmem>>, vector<32x256xbf16>,
    %c0_97 = arith.constant 0 : index
    %c512_98 = arith.constant 512 : index
    %128 = vector.load %arg4[%c0_97, %c512_98] : memref<1x768xf32, #tpu.memory_space<vmem>>, vector<1x256xf32>
    %129 = vector.broadcast %128 : vector<1x256xf32> to vector<32x256xf32>
    %130 = arith.mulf %125, %129 : vector<32x256xf32>
    %cst_99 = arith.constant dense<0.000000e+00> : vector<32xf32>
    %131 = vector.multi_reduction <add>, %130, %cst_99 [1] : vector<32x256xf32> to vector<32xf32>
    %132 = vector.shape_cast %131 : vector<32xf32> to vector<32x1xf32>
    %133 = arith.addf %95, %132 : vector<32x1xf32>
    %134 = arith.mulf %130, %125 : vector<32x256xf32>
    %cst_100 = arith.constant dense<0.000000e+00> : vector<32xf32>
    %135 = vector.multi_reduction <add>, %134, %cst_100 [1] : vector<32x256xf32> to vector<32xf32>
    %136 = vector.shape_cast %135 : vector<32xf32> to vector<32x1xf32>
    %137 = arith.addf %99, %136 : vector<32x1xf32>
    %c0_101 = arith.constant 0 : index
    %c0_102 = arith.constant 0 : index
    %c0_103 = arith.constant 0 : index
    %138 = vector.load %arg6[%c0_101, %c0_102, %c0_103] : memref<1x32x1xf32, #tpu.memory_space<vmem>>, vector<1x32x1xf32>
    %139 = vector.shape_cast %138 : vector<1x32x1xf32> to vector<32x1xf32>
    %140 = vector.shape_cast %133 : vector<32x1xf32> to vector<1x32x1xf32>
    tpu.vector_store %arg6[%c0_101, %c0_102, %c0_103], %140 {strides = array<i32>} : memref<1x32x1xf32, #tpu.memory_space<vmem>>, vector<1x32x1xf32>,
    %c0_104 = arith.constant 0 : index
    %c0_105 = arith.constant 0 : index
    %c0_106 = arith.constant 0 : index
    %141 = vector.load %arg7[%c0_104, %c0_105, %c0_106] : memref<1x32x1xf32, #tpu.memory_space<vmem>>, vector<1x32x1xf32>
    %142 = vector.shape_cast %141 : vector<1x32x1xf32> to vector<32x1xf32>
    %143 = vector.shape_cast %137 : vector<32x1xf32> to vector<1x32x1xf32>
    tpu.vector_store %arg7[%c0_104, %c0_105, %c0_106], %143 {strides = array<i32>} : memref<1x32x1xf32, #tpu.memory_space<vmem>>, vector<1x32x1xf32>,
    return
  }
  func.func @transform_0(%arg0: i32) -> (i32, i32, i32) {
    %c0_i32 = arith.constant 0 : i32
    %c0_i32_0 = arith.constant 0 : i32
    %c0_i32_1 = arith.constant 0 : i32
    %c0_i32_2 = arith.constant 0 : i32
    return %c0_i32, %c0_i32_0, %c0_i32_1 : i32, i32, i32
  }
  func.func @transform_1(%arg0: i32) -> (i32, i32) {
    %c0_i32 = arith.constant 0 : i32
    %c0_i32_0 = arith.constant 0 : i32
    return %c0_i32, %arg0 : i32, i32
  }
  func.func @transform_2(%arg0: i32) -> (i32, i32) {
    %c1_i32 = arith.constant 1 : i32
    %0 = arith.addi %arg0, %c1_i32 : i32
    %c6_i32 = arith.constant 6 : i32
    %1 = arith.muli %0, %c6_i32 : i32
    %c0_i32 = arith.constant 0 : i32
    %c0_i32_0 = arith.constant 0 : i32
    return %c0_i32, %1 : i32, i32
  }
  func.func @transform_3(%arg0: i32) -> (i32, i32) {
    %c0_i32 = arith.constant 0 : i32
    %c0_i32_0 = arith.constant 0 : i32
    return %c0_i32, %arg0 : i32, i32
  }
  func.func @transform_4(%arg0: i32) -> (i32, i32) {
    %c0_i32 = arith.constant 0 : i32
    %c0_i32_0 = arith.constant 0 : i32
    return %c0_i32, %arg0 : i32, i32
  }
  func.func @transform_5(%arg0: i32) -> (i32, i32, i32) {
    %c0_i32 = arith.constant 0 : i32
    %c0_i32_0 = arith.constant 0 : i32
    %c0_i32_1 = arith.constant 0 : i32
    return %arg0, %c0_i32, %c0_i32_0 : i32, i32, i32
  }
  func.func @transform_6(%arg0: i32) -> (i32, i32, i32) {
    %c0_i32 = arith.constant 0 : i32
    %c0_i32_0 = arith.constant 0 : i32
    %c0_i32_1 = arith.constant 0 : i32
    return %arg0, %c0_i32, %c0_i32_0 : i32, i32, i32
  }
}

</mosaic_0001>

<bundles_post_ra>
// kernel: tpu_custom_call.1
= control target key start
LH: loop header
LB: loop body
LE: loop exit
PB: predicated region body
PF: predicated region fallthrough
CT: control target
= control target key end

     0   :  { %s2966_s29 = smov 127   ;;  %v2967_v6 = vmov 0   ;;  %s3609_s0 = inlined_call_operand.vmem [shape: bf16[9,32,8], index: 0, kind: input, shape index: {}]   ;;  %s3610_s1 = inlined_call_operand.vmem [shape: bf16[8,1536], index: 1, kind: input, shape index: {}]   ;;  %s3611_s2 = inlined_call_operand.vmem [shape: bf16[8,1536], index: 2, kind: input, shape index: {}]   ;;  %s3612_s3 = inlined_call_operand.vmem [shape: f32[1,768], index: 3, kind: input, shape index: {}]   ;;  %s3613_s4 = inlined_call_operand.hbm [shape: bf16[32,768], index: 4, kind: output, shape index: {0}]   ;;  %s3614_s5 = inlined_call_operand.vmem [shape: f32[1,32,1], index: 5, kind: output, shape index: {1}]   ;;  %s3615_s6 = inlined_call_operand.vmem [shape: f32[1,32,1], index: 6, kind: output, shape index: {2}]  }
   0x1   :  { %v45_v0 = vld [vmem:[%s3610_s1 + $0x8] sm:$0xff]  ;;  %v44_v1 = vld [vmem:[%s3610_s1] sm:$0xff]  ;;  %v46_v2 = vld [vmem:[%s3610_s1 + $0x10] sm:$0xff]  ;;  %171 = vmatprep.mubr.bf16.mxu1 %v2967_v6  ;;  %514 = vmatprep.mubr.bf16.mxu0 %v2967_v6  ;;  %s2968_s1 = smov 109  }
   0x2   :  { %48 = vst [vmem:[#allocation2 + $0x8] sm:$0xff] %v45_v0  ;;  %v3022_v3 = vcombine.low %v44_v1, %v44_v1  ;;  %49 = vst [vmem:[#allocation2 + $0x10] sm:$0xff] %v46_v2  ;;  %v2542_v4 = vld [vmem:[%s3611_s2 + $0x18] sm:$0xf]  ;;  %v3029_v5 = vcombine.high %v44_v1, %v44_v1  ;;  %s2969_s2 = smov 108  }
   0x3   :  { %51 = vst [vmem:[#allocation2 + $0x18] sm:$0xf] %v2542_v4 }
   0x4   :  { %116 = vrot.lane.b32.xlu0 %v3022_v3, %s2966_s29 }
   0x8   :  { %118 = vrot.lane.b32.xlu0 %v3029_v5, %s2966_s29 }
   0x9   :  { %v2915_v7 = vld [vmem:[#allocation2 + $0x8] ss:$0 sps:$4 sm:$0xff]  }
   0xa   :  { %120 = vrot.lane.b32.xlu1 %v2915_v7, %s2966_s29 }
   0xc   :  { %463 = vrot.lane.b32.xlu0 %v3029_v5, %s2968_s1 }
   0xe   :  { %461 = vrot.lane.b32.xlu1 %v3022_v3, %s2968_s1 }
  0x10   :  { %553 = vrot.lane.b32.xlu0 %v3022_v3, %s2969_s2 }
  0x12   :  { %465 = vrot.lane.b32.xlu1 %v2915_v7, %s2968_s1 }
  0x13   :  { %12 = vsyncpa [#allocation4], 0  ;;  %s2970_s30 = smov 92   ;;  %s2971_s7 = smov 126   ;;  %v3068_v8 = vcombine.low %v45_v0, %v45_v0  ;;  %v3074_v9 = vld [vmem:[#allocation2 + $0x10] ss:$0 sps:$4 sm:$0xff]   ;;  %v3077_v10 = vcombine.high %v45_v0, %v45_v0  ;;  %v3081_v11 = vcombine.high %v46_v2, %v46_v2  ;;  %v3085_v12 = vcombine.low %v46_v2, %v46_v2 }
  0x14   :  { %557 = vrot.lane.b32.xlu0 %v2915_v7, %s2969_s2  ;;  %s2972_s8 = smov 91   ;;  %s2973_s9 = smov 110   ;;  %v3091_v13 = vld [vmem:[#allocation2 + $0x18] ss:$0 sps:$4 sm:$0xff]   ;;  %vm122_vm0 = vcmask 1039360   ;;  %vm132_vm1 = vcmask 1043456  }
  0x15   :  { %s2974_s10 = smov 90   ;;  %v3162_v21 = vld [vmem:[%s3609_s0 + $0x10] sm:$0xff]   ;;  %vm125_vm2 = vcmask 64512   ;;  %vm467_vm3 = vcmask 891904   ;;  %v209_v23 = vsel %vm132_vm1, %v3022_v3, 0  ;;  %vm559_vm4 = vcmask 883712  }
  0x16   :  { %555 = vrot.lane.b32.xlu1 %v3029_v5, %s2969_s2  ;;  %v3191_v30 = vld [vmem:[%s3609_s0 + $0x40] sm:$0xff]   ;;  %v3196_v31 = vld [vmem:[%s3609_s0 + $0x18] sm:$0xff]   ;;  %vm651_vm5 = vcmask 752640   ;;  %vm283_vm6 = vcmask 1031168   ;;  %v3234_v44 = vld [vmem:[%s3609_s0 + $0x50] sm:$0xff]   ;;  %vm743_vm7 = vcmask 744448  }
  0x17   :  { %v3220_v39 = vld [vmem:[%s3609_s0] sm:$0xff]   ;;  %v3249_v51 = vld [vmem:[%s3609_s0 + $0x8] sm:$0xff]   ;;  %v3259_v54 = vld [vmem:[%s3609_s0 + $0x58] sm:$0xff]   ;;  %vm375_vm8 = vcmask 900096   ;;  %vm835_vm9 = vcmask 736256  }
  0x18   :  { %647 = vrot.lane.b32.xlu0 %v3029_v5, %s2970_s30  ;;  %v3269_v58 = vld [vmem:[%s3609_s0 + $0x20] sm:$0xff]   ;;  %v3293_v4 = vld [vmem:[%s3609_s0 + $0x28] sm:$0xff]  }
  0x19   :  { %v3282_v0 = vld [vmem:[%s3609_s0 + $0x60] sm:$0xff]  }
  0x1a   :  { %645 = vrot.lane.b32.xlu1 %v3022_v3, %s2970_s30 }
  0x1c   :  { %277 = vrot.lane.b32.xlu0 %v3022_v3, %s2971_s7 }
  0x1e   :  { %649 = vrot.lane.b32.xlu1 %v2915_v7, %s2970_s30 }
  0x20   :  { %281 = vrot.lane.b32.xlu0 %v2915_v7, %s2971_s7 }
  0x22   :  { %279 = vrot.lane.b32.xlu1 %v3029_v5, %s2971_s7 }
  0x24   :  { %739 = vrot.lane.b32.xlu0 %v3029_v5, %s2972_s8 }
  0x26   :  { %737 = vrot.lane.b32.xlu1 %v3022_v3, %s2972_s8 }
  0x28   :  { %369 = vrot.lane.b32.xlu0 %v3022_v3, %s2973_s9 }
  0x2a   :  { %741 = vrot.lane.b32.xlu1 %v2915_v7, %s2972_s8 }
  0x2c   :  { %373 = vrot.lane.b32.xlu0 %v2915_v7, %s2973_s9 }
  0x2e   :  { %371 = vrot.lane.b32.xlu1 %v3029_v5, %s2973_s9 }
  0x30   :  { %831 = vrot.lane.b32.xlu0 %v3029_v5, %s2974_s10 }
  0x32   :  { %829 = vrot.lane.b32.xlu1 %v3022_v3, %s2974_s10 }
  0x34   :  { %1009 = vrot.lane.b32.xlu0 %v3068_v8, %s2966_s29 }
  0x36   :  { %833 = vrot.lane.b32.xlu1 %v2915_v7, %s2974_s10 }
  0x38   :  { %1013 = vrot.lane.b32.xlu0 %v3074_v9, %s2966_s29 }
  0x3a   :  { %1011 = vrot.lane.b32.xlu1 %v3077_v10, %s2966_s29 }
  0x3c   :  { %1761 = vrot.lane.b32.xlu0 %v3081_v11, %s2966_s29 }
  0x3e   :  { %1759 = vrot.lane.b32.xlu1 %v3085_v12, %s2966_s29 }
  0x40   :  { %1135 = vrot.lane.b32.xlu0 %v3068_v8, %s2971_s7 }
  0x42   :  { %1763 = vrot.lane.b32.xlu1 %v3091_v13, %s2966_s29 }
  0x44   :  { %1139 = vrot.lane.b32.xlu0 %v3074_v9, %s2971_s7 }
  0x46   :  { %1137 = vrot.lane.b32.xlu1 %v3077_v10, %s2971_s7 }
  0x48   :  { %1892 = vrot.lane.b32.xlu0 %v3081_v11, %s2971_s7 }
  0x4a   :  { %1890 = vrot.lane.b32.xlu1 %v3085_v12, %s2971_s7 }
  0x4c   :  { %1210 = vrot.lane.b32.xlu0 %v3068_v8, %s2973_s9 }
  0x4e   :  { %1894 = vrot.lane.b32.xlu1 %v3091_v13, %s2971_s7 }
  0x50   :  { %1214 = vrot.lane.b32.xlu0 %v3074_v9, %s2973_s9 }
  0x52   :  { %1212 = vrot.lane.b32.xlu1 %v3077_v10, %s2973_s9 }
  0x54   :  { %1967 = vrot.lane.b32.xlu0 %v3081_v11, %s2973_s9 }
  0x56   :  { %1965 = vrot.lane.b32.xlu1 %v3085_v12, %s2973_s9 }
  0x58   :  { %1285 = vrot.lane.b32.xlu0 %v3068_v8, %s2968_s1 }
  0x5a   :  { %1969 = vrot.lane.b32.xlu1 %v3091_v13, %s2973_s9 }
  0x5c   :  { %1289 = vrot.lane.b32.xlu0 %v3074_v9, %s2968_s1 }
  0x5e   :  { %1287 = vrot.lane.b32.xlu1 %v3077_v10, %s2968_s1 }
  0x60   :  { %2042 = vrot.lane.b32.xlu0 %v3081_v11, %s2968_s1 }
  0x62   :  { %2040 = vrot.lane.b32.xlu1 %v3085_v12, %s2968_s1 }
  0x64   :  { %1360 = vrot.lane.b32.xlu0 %v3068_v8, %s2969_s2 }
  0x66   :  { %2044 = vrot.lane.b32.xlu1 %v3091_v13, %s2968_s1 }
  0x68   :  { %1364 = vrot.lane.b32.xlu0 %v3074_v9, %s2969_s2 }
  0x6a   :  { %1362 = vrot.lane.b32.xlu1 %v3077_v10, %s2969_s2 }
  0x6c   :  { %2117 = vrot.lane.b32.xlu0 %v3081_v11, %s2969_s2 }
  0x6e   :  { %2115 = vrot.lane.b32.xlu1 %v3085_v12, %s2969_s2 }
  0x70   :  { %1435 = vrot.lane.b32.xlu0 %v3068_v8, %s2970_s30 }
  0x72   :  { %2119 = vrot.lane.b32.xlu1 %v3091_v13, %s2969_s2 }
  0x74   :  { %1439 = vrot.lane.b32.xlu0 %v3074_v9, %s2970_s30 }
  0x76   :  { %v117_v14 = vpop.permute.xlu0 %116  ;;  %1437 = vrot.lane.b32.xlu1 %v3077_v10, %s2970_s30 }
  0x78   :  { %2192 = vrot.lane.b32.xlu0 %v3081_v11, %s2970_s30 }
  0x7a   :  { %v119_v15 = vpop.permute.xlu0 %118  ;;  %2190 = vrot.lane.b32.xlu1 %v3085_v12, %s2970_s30 }
  0x7b   :  { %v123_v16 = vsel %vm122_vm0, %v117_v14, %v119_v15 }
  0x7c   :  { %1510 = vrot.lane.b32.xlu0 %v3068_v8, %s2972_s8  ;;  %v121_v17 = vpop.permute.xlu1 %120  ;;  %v134_v18 = vsel %vm132_vm1, %v123_v16, 0  ;;  %v3311_v16 = vld [vmem:[%s3609_s0 + $0x30] sm:$0xff]  }
  0x7d   :  { %v124_v19 = vsel %vm122_vm0, %v119_v15, %v121_v17 }
  0x7e   :  { %v464_v20 = vpop.permute.xlu0 %463  ;;  %2580 = vmatprep.subr.msk.bf16.mxu1 %vm132_vm1, %v124_v19  ;;  %2194 = vrot.lane.b32.xlu1 %v3091_v13, %s2970_s30 }
  0x7f   :  { %140 = vmatpush1.bf16.msra.mxu1 %v134_v18 }
  0x80   :  { %1514 = vrot.lane.b32.xlu0 %v3074_v9, %s2972_s8  ;;  %v462_v22 = vpop.permute.xlu1 %461  ;;  %2585 = vmatprep.subr.msk.bf16.mxu1 %vm132_vm1, %v3029_v5 }
  0x81   :  { %v468_v25 = vsel %vm467_vm3, %v462_v22, %v464_v20 }
  0x82   :  { %v554_v24 = vpop.permute.xlu0 %553  ;;  %2581 = vmatmul.mubr.msk.bf16.vlgmr.msra.gmra.mrb[0].mxu1 %vm125_vm2, %v3162_v21  ;;  %1512 = vrot.lane.b32.xlu1 %v3077_v10, %s2972_s8  ;;  %v3186_v29 = vsel %vm132_vm1, %v468_v25, 0 }
  0x83   :  { %215 = vmatpush1.bf16.msra.mxu1 %v209_v23  ;;  %181 = vmatprep.mubr.bf16.mxu1 %v2967_v6 }
  0x84   :  { %v466_v26 = vpop.permute.xlu1 %465  ;;  %2267 = vrot.lane.b32.xlu0 %v3081_v11, %s2972_s8 }
  0x85   :  { %v3181_v27 = vsel %vm467_vm3, %v464_v20, %v466_v26  ;;  %v3321_v20 = vld [vmem:[%s3609_s0 + $0x70] sm:$0xff]   ;;  %v3333_v26 = vld [vmem:[%s3609_s0 + $0x38] sm:$0xff]  }
  0x86   :  { %v558_v28 = vpop.permute.xlu0 %557  ;;  %2600 = vmatprep.subr.msk.bf16.mxu0 %vm132_vm1, %v3181_v27  ;;  %2265 = vrot.lane.b32.xlu1 %v3085_v12, %s2972_s8 }
  0x87   :  { %483 = vmatpush1.bf16.msra.mxu0 %v3186_v29 }
  0x88   :  { %v556_v32 = vpop.permute.xlu1 %555  ;;  %1585 = vrot.lane.b32.xlu0 %v3068_v8, %s2974_s10 }
  0x89   :  { %v560_v33 = vsel %vm559_vm4, %v554_v24, %v556_v32  ;;  %v561_v34 = vsel %vm559_vm4, %v556_v32, %v558_v28  ;;  %v3353_v32 = vld [vmem:[%s3609_s0 + $0x80] sm:$0xff]  }
  0x8a   :  { %v648_v35 = vpop.permute.xlu0 %647  ;;  %v569_v36 = vsel %vm132_vm1, %v560_v33, 0  ;;  %2601 = vmatmul.mubr.msk.bf16.vlgmr.msra.gmra.mrb[0].mxu0 %vm125_vm2, %v3191_v30  ;;  %2582 = vmatmul.mubr.msk.bf16.gmra.mrb[4].mxu1 %vm125_vm2, %v3196_v31  ;;  %v3358_v33 = vld [vmem:[%s3609_s0 + $0x48] sm:$0xff]  }
  0x8b   :  { %2605 = vmatprep.subr.msk.bf16.mxu0 %vm132_vm1, %v561_v34  ;;  %246 = vmatprep.mubr.bf16.mxu1 %v2967_v6 }
  0x8c   :  { %v646_v37 = vpop.permute.xlu1 %645  ;;  %575 = vmatpush1.bf16.msra.mxu0 %v569_v36  ;;  %606 = vmatprep.mubr.bf16.mxu0 %v2967_v6 }
  0x8d   :  { %2269 = vrot.lane.b32.xlu1 %v3091_v13, %s2972_s8  ;;  %1589 = vrot.lane.b32.xlu0 %v3074_v9, %s2974_s10  ;;  %v652_v41 = vsel %vm651_vm5, %v646_v37, %v648_v35 }
  0x8e   :  { %v278_v38 = vpop.permute.xlu0 %277  ;;  %v661_v45 = vsel %vm132_vm1, %v652_v41, 0  ;;  %v1077_v41 = vsel %vm132_vm1, %v3068_v8, 0  ;;  %v1832_v8 = vsel %vm132_vm1, %v3085_v12, 0 }
  0x90   :  { %v650_v40 = vpop.permute.xlu1 %649 }
  0x91   :  { %v653_v42 = vsel %vm651_vm5, %v648_v35, %v650_v40  ;;  %1587 = vrot.lane.b32.xlu1 %v3077_v10, %s2974_s10  ;;  %2342 = vrot.lane.b32.xlu0 %v3081_v11, %s2974_s10 }
  0x92   :  { %v282_v43 = vpop.permute.xlu0 %281  ;;  %2610 = vmatprep.subr.msk.bf16.mxu0 %vm132_vm1, %v653_v42  ;;  %2586 = vmatmul.mubr.msk.bf16.vlgmr.msra.gmra.mrb[0].mxu1 %vm125_vm2, %v3220_v39 }
  0x93   :  { %256 = vmatprep.mubr.bf16.mxu1 %v2967_v6 }
  0x94   :  { %v280_v46 = vpop.permute.xlu1 %279 }
  0x95   :  { %v284_v47 = vsel %vm283_vm6, %v278_v38, %v280_v46  ;;  %v285_v48 = vsel %vm283_vm6, %v280_v46, %v282_v43  ;;  %2340 = vrot.lane.b32.xlu1 %v3085_v12, %s2974_s10  ;;  %v3375_v38 = vld [vmem:[%s3609_s0 + $0x88] sm:$0xff]  }
  0x96   :  { %v740_v49 = vpop.permute.xlu0 %739  ;;  %v293_v50 = vsel %vm132_vm1, %v284_v47, 0  ;;  %2606 = vmatmul.mubr.msk.bf16.vlgmr.msra.gmra.mrb[0].mxu0 %vm125_vm2, %v3234_v44  ;;  %2590 = vmatprep.subr.msk.bf16.mxu1 %vm132_vm1, %v285_v48 }
  0x97   :  { %667 = vmatpush1.bf16.msra.mxu0 %v661_v45  ;;  %299 = vmatpush1.bf16.msra.mxu1 %v293_v50 }
  0x98   :  { %v738_v52 = vpop.permute.xlu1 %737  ;;  %616 = vmatprep.mubr.bf16.mxu0 %v2967_v6 }
  0x99   :  { %2344 = vrot.lane.b32.xlu1 %v3091_v13, %s2974_s10  ;;  %v744_v60 = vsel %vm743_vm7, %v738_v52, %v740_v49  ;;  %v3302_v13 = vld [vmem:[%s3609_s0 + $0x68] sm:$0xff]  }
  0x9a   :  { %v370_v53 = vpop.permute.xlu0 %369  ;;  %2587 = vmatmul.mubr.msk.bf16.gmra.mrb[4].mxu1 %vm125_vm2, %v3249_v51  ;;  %v753_v2 = vsel %vm132_vm1, %v744_v60, 0 }
  0x9b   :  { %330 = vmatprep.mubr.bf16.mxu1 %v2967_v6 }
  0x9c   :  { %v742_v55 = vpop.permute.xlu1 %741 }
  0x9d   :  { %v745_v56 = vsel %vm743_vm7, %v740_v49, %v742_v55 }
  0x9e   :  { %2607 = vmatmul.mubr.msk.bf16.gmra.mrb[4].mxu0 %vm125_vm2, %v3259_v54  ;;  %2615 = vmatprep.subr.msk.bf16.mxu0 %vm132_vm1, %v745_v56  ;;  %v374_v57 = vpop.permute.xlu0 %373 }
  0x9f   :  { %698 = vmatprep.mubr.bf16.mxu0 %v2967_v6 }
  0xa0   :  { %v372_v59 = vpop.permute.xlu1 %371 }
  0xa1   :  { %v376_v61 = vsel %vm375_vm8, %v370_v53, %v372_v59  ;;  %v377_v62 = vsel %vm375_vm8, %v372_v59, %v374_v57 }
  0xa2   :  { %v385_v63 = vsel %vm132_vm1, %v376_v61, 0  ;;  %2591 = vmatmul.mubr.msk.bf16.vlgmr.msra.gmra.mrb[0].mxu1 %vm125_vm2, %v3269_v58  ;;  %2595 = vmatprep.subr.msk.bf16.mxu1 %vm132_vm1, %v377_v62  ;;  %v832_v1 = vpop.permute.xlu0 %831 }
  0xa3   :  { %391 = vmatpush1.bf16.msra.mxu1 %v385_v63  ;;  %340 = vmatprep.mubr.bf16.mxu1 %v2967_v6 }
  0xa4   :  { %2709 = vmatprep.subr.msk.bf16.mxu1 %vm132_vm1, %v3181_v27  ;;  %v830_v3 = vpop.permute.xlu1 %829  ;;  %v3342_v27 = vld [vmem:[%s3609_s0 + $0x78] sm:$0xff]  }
  0xa5   :  { %v836_v18 = vsel %vm835_vm9, %v830_v3, %v832_v1 }
  0xa6   :  { %2611 = vmatmul.mubr.msk.bf16.vlgmr.msra.gmra.mrb[0].mxu0 %vm125_vm2, %v3282_v0  ;;  %v1010_v5 = vpop.permute.xlu0 %1009  ;;  %v845_v23 = vsel %vm132_vm1, %v836_v18, 0 }
  0xa7   :  { %759 = vmatpush1.bf16.msra.mxu0 %v753_v2  ;;  %708 = vmatprep.mubr.bf16.mxu0 %v2967_v6 }
  0xa8   :  { %v834_v7 = vpop.permute.xlu1 %833 }
  0xa9   :  { %v837_v9 = vsel %vm835_vm9, %v832_v1, %v834_v7 }
  0xaa   :  { %2592 = vmatmul.mubr.msk.bf16.gmra.mrb[4].mxu1 %vm125_vm2, %v3293_v4  ;;  %2620 = vmatprep.subr.msk.bf16.mxu0 %vm132_vm1, %v837_v9  ;;  %v1014_v15 = vpop.permute.xlu0 %1013 }
  0xab   :  { %422 = vmatprep.mubr.bf16.mxu1 %v2967_v6 }
  0xac   :  { %v1012_v14 = vpop.permute.xlu1 %1011 }
  0xad   :  { %v1016_v19 = vsel %vm122_vm0, %v1012_v14, %v1014_v15  ;;  %v1015_v28 = vsel %vm122_vm0, %v1010_v5, %v1012_v14 }
  0xae   :  { %2612 = vmatmul.mubr.msk.bf16.gmra.mrb[4].mxu0 %vm125_vm2, %v3302_v13  ;;  %v1762_v22 = vpop.permute.xlu0 %1761  ;;  %v1018_v34 = vsel %vm132_vm1, %v1015_v28, 0 }
  0xaf   :  { %790 = vmatprep.mubr.bf16.mxu0 %v2967_v6 }
  0xb0   :  { %v1760_v17 = vpop.permute.xlu1 %1759 }
  0xb2   :  { %2596 = vmatmul.mubr.msk.bf16.vlgmr.msra.gmra.mrb[0].mxu1 %vm125_vm2, %v3311_v16  ;;  %v1136_v36 = vpop.permute.xlu0 %1135 }
  0xb3   :  { %2710 = vmatpush1.bf16.msra.mxu1 %v3186_v29  ;;  %432 = vmatprep.mubr.bf16.mxu1 %v2967_v6  ;;  %v1765_v29 = vsel %vm122_vm0, %v1760_v17, %v1762_v22 }
  0xb4   :  { %2630 = vmatprep.subr.msk.bf16.mxu1 %vm132_vm1, %v1016_v19  ;;  %v1764_v24 = vpop.permute.xlu1 %1763  ;;  %v1768_v35 = vsel %vm132_vm1, %v1765_v29, 0 }
  0xb5   :  { %v1766_v25 = vsel %vm122_vm0, %v1762_v22, %v1764_v24 }
  0xb6   :  { %2616 = vmatmul.mubr.msk.bf16.vlgmr.msra.gmra.mrb[0].mxu0 %vm125_vm2, %v3321_v20  ;;  %v1140_v40 = vpop.permute.xlu0 %1139 }
  0xb7   :  { %851 = vmatpush1.bf16.msra.mxu0 %v845_v23  ;;  %800 = vmatprep.mubr.bf16.mxu0 %v2967_v6 }
  0xb8   :  { %2664 = vmatprep.subr.msk.bf16.mxu0 %vm132_vm1, %v1766_v25  ;;  %v1138_v37 = vpop.permute.xlu1 %1137 }
  0xb9   :  { %v1142_v43 = vsel %vm283_vm6, %v1138_v37, %v1140_v40  ;;  %v1141_v48 = vsel %vm283_vm6, %v1136_v36, %v1138_v37 }
  0xba   :  { %2597 = vmatmul.mubr.msk.bf16.gmra.mrb[4].mxu1 %vm125_vm2, %v3333_v26  ;;  %v1144_v49 = vsel %vm132_vm1, %v1141_v48, 0 }
  0xbb   :  { %524 = vmatprep.mubr.bf16.mxu1 %v2967_v6 }
  0xbc   :  { %v1891_v42 = vpop.permute.xlu1 %1890 }
  0xbe   :  { %2617 = vmatmul.mubr.msk.bf16.gmra.mrb[4].mxu0 %vm125_vm2, %v3342_v27 }
  0xbf   :  { %882 = vmatprep.mubr.bf16.mxu0 %v2967_v6 }
  0xc6   :  { %2621 = vmatmul.mubr.msk.bf16.vlgmr.msra.gmra.mrb[0].mxu0 %vm125_vm2, %v3353_v32  ;;  %2602 = vmatmul.mubr.msk.bf16.vlgmr.msra.gmra.mrb[4].mxu1 %vm125_vm2, %v3358_v33 }
  0xc7   :  { %1774 = vmatpush1.bf16.msra.mxu0 %v1768_v35  ;;  %1024 = vmatpush1.bf16.msra.mxu1 %v1018_v34 }
  0xc8   :  { %892 = vmatprep.mubr.bf16.mxu0 %v2967_v6  ;;  %1055 = vmatprep.mubr.bf16.mxu1 %v2967_v6 }
  0xc9   :  { %2633 = vmatprep.subr.msk.bf16.mxu1 %vm132_vm1, %v3077_v10  ;;  %2669 = vmatprep.subr.msk.bf16.mxu0 %vm132_vm1, %v3081_v11  ;;  %v1893_v10 = vpop.permute.xlu0 %1892  ;;  %v1895_v11 = vpop.permute.xlu1 %1894 }
  0xca   :  { %v1897_v46 = vsel %vm283_vm6, %v1893_v10, %v1895_v11  ;;  %v1896_v53 = vsel %vm283_vm6, %v1891_v42, %v1893_v10 }
  0xcb   :  { %v1899_v56 = vsel %vm132_vm1, %v1896_v53, 0 }
  0xcd   :  { %v1211_v45 = vpop.permute.xlu0 %1210  ;;  %v1213_v47 = vpop.permute.xlu1 %1212 }
  0xce   :  { %2622 = vmatmul.mubr.msk.bf16.gmra.mrb[4].mxu0 %vm125_vm2, %v3375_v38  ;;  %2631 = vmatmul.mubr.msk.bf16.vlgmr.msra.gmra.mrb[8].mxu1 %vm125_vm2, %v3162_v21  ;;  %v1216_v60 = vsel %vm375_vm8, %v1211_v45, %v1213_v47 }
  0xcf   :  { %1805 = vmatprep.mubr.bf16.mxu0 %v2967_v6  ;;  %1083 = vmatpush1.bf16.msra.mxu1 %v1077_v41  ;;  %v1219_v62 = vsel %vm132_vm1, %v1216_v60, 0 }
  0xd0   :  { %1065 = vmatprep.mubr.bf16.mxu1 %v2967_v6  ;;  %2636 = vmatprep.subr.msk.bf16.mxu1 %vm132_vm1, %v1142_v43 }
  0xd1   :  { %v1215_v12 = vpop.permute.xlu0 %1214  ;;  %v1966_v50 = vpop.permute.xlu1 %1965 }
  0xd2   :  { %v1217_v52 = vsel %vm375_vm8, %v1213_v47, %v1215_v12 }
  0xd5   :  { %v1970_v55 = vpop.permute.xlu1 %1969 }
  0xd6   :  { %2665 = vmatmul.mubr.msk.bf16.vlgmr.msra.gmra.mrb[8].mxu0 %vm125_vm2, %v3162_v21  ;;  %2632 = vmatmul.mubr.msk.bf16.gmra.mrb[12].mxu1 %vm125_vm2, %v3196_v31  ;;  %v1968_v21 = vpop.permute.xlu0 %1967 }
  0xd7   :  { %1838 = vmatpush1.bf16.msra.mxu0 %v1832_v8  ;;  %1815 = vmatprep.mubr.bf16.mxu0 %v2967_v6  ;;  %v1972_v59 = vsel %vm375_vm8, %v1968_v21, %v1970_v55  ;;  %v1971_v2 = vsel %vm375_vm8, %v1966_v50, %v1968_v21 }
  0xd8   :  { %1114 = vmatprep.mubr.bf16.mxu1 %v2967_v6  ;;  %2672 = vmatprep.subr.msk.bf16.mxu0 %vm132_vm1, %v1897_v46  ;;  %v1974_v5 = vsel %vm132_vm1, %v1971_v2, 0 }
  0xda   :  { %v1286_v57 = vpop.permute.xlu0 %1285 }
  0xde   :  { %2666 = vmatmul.mubr.msk.bf16.gmra.mrb[12].mxu0 %vm125_vm2, %v3196_v31  ;;  %2634 = vmatmul.mubr.msk.bf16.vlgmr.msra.gmra.mrb[8].mxu1 %vm125_vm2, %v3220_v39  ;;  %v1288_v31 = vpop.permute.xlu1 %1287  ;;  %v1290_v61 = vpop.permute.xlu0 %1289 }
  0xdf   :  { %1150 = vmatpush1.bf16.msra.mxu1 %v1144_v49  ;;  %1869 = vmatprep.mubr.bf16.mxu0 %v2967_v6  ;;  %v1292_v1 = vsel %vm467_vm3, %v1288_v31, %v1290_v61  ;;  %v1291_v14 = vsel %vm467_vm3, %v1286_v57, %v1288_v31 }
  0xe0   :  { %1124 = vmatprep.mubr.bf16.mxu1 %v2967_v6  ;;  %2639 = vmatprep.subr.msk.bf16.mxu1 %vm132_vm1, %v1217_v52  ;;  %v1294_v17 = vsel %vm132_vm1, %v1291_v14, 0 }
  0xe2   :  { %v2041_v63 = vpop.permute.xlu1 %2040 }
  0xe6   :  { %2670 = vmatmul.mubr.msk.bf16.vlgmr.msra.gmra.mrb[8].mxu0 %vm125_vm2, %v3220_v39  ;;  %2635 = vmatmul.mubr.msk.bf16.gmra.mrb[12].mxu1 %vm125_vm2, %v3249_v51  ;;  %v2043_v39 = vpop.permute.xlu0 %2042  ;;  %v2045_v3 = vpop.permute.xlu1 %2044 }
  0xe7   :  { %1905 = vmatpush1.bf16.msra.mxu0 %v1899_v56  ;;  %1879 = vmatprep.mubr.bf16.mxu0 %v2967_v6  ;;  %v2047_v9 = vsel %vm467_vm3, %v2043_v39, %v2045_v3  ;;  %v2046_v22 = vsel %vm467_vm3, %v2041_v63, %v2043_v39  ;;  %v941_v39 = vlaneseq }
  0xe8   :  { %1181 = vmatprep.mubr.bf16.mxu1 %v2967_v6  ;;  %2675 = vmatprep.subr.msk.bf16.mxu0 %vm132_vm1, %v1972_v59  ;;  %v2049_v24 = vsel %vm132_vm1, %v2046_v22, 0 }
  0xe9   :  { %v942_v2 = vshrl.u32 %v941_v39, 7  ;;  %v2443_v39 = vld [vmem:[%s3612_s3 + $0x4] sm:$0x3] }
  0xea   :  { %v1361_v7 = vpop.permute.xlu0 %1360 }
  0xeb   :  { %v3546_v3 = vsub.s32 0, %v942_v2 }
  0xee   :  { %2671 = vmatmul.mubr.msk.bf16.gmra.mrb[12].mxu0 %vm125_vm2, %v3249_v51  ;;  %2637 = vmatmul.mubr.msk.bf16.vlgmr.msra.gmra.mrb[8].mxu1 %vm125_vm2, %v3269_v58  ;;  %v1363_v51 = vpop.permute.xlu1 %1362  ;;  %v1365_v15 = vpop.permute.xlu0 %1364 }
  0xef   :  { %1225 = vmatpush1.bf16.msra.mxu1 %v1219_v62  ;;  %1936 = vmatprep.mubr.bf16.mxu0 %v2967_v6  ;;  %v1367_v19 = vsel %vm559_vm4, %v1363_v51, %v1365_v15  ;;  %v1366_v29 = vsel %vm559_vm4, %v1361_v7, %v1363_v51 }
  0xf0   :  { %1191 = vmatprep.mubr.bf16.mxu1 %v2967_v6  ;;  %2642 = vmatprep.subr.msk.bf16.mxu1 %vm132_vm1, %v1292_v1  ;;  %v1369_v35 = vsel %vm132_vm1, %v1366_v29, 0 }
  0xf2   :  { %v2116_v18 = vpop.permute.xlu1 %2115 }
  0xf6   :  { %2673 = vmatmul.mubr.msk.bf16.vlgmr.msra.gmra.mrb[8].mxu0 %vm125_vm2, %v3269_v58  ;;  %2638 = vmatmul.mubr.msk.bf16.gmra.mrb[12].mxu1 %vm125_vm2, %v3293_v4  ;;  %v2118_v58 = vpop.permute.xlu0 %2117  ;;  %v2120_v23 = vpop.permute.xlu1 %2119 }
  0xf7   :  { %1980 = vmatpush1.bf16.msra.mxu0 %v1974_v5  ;;  %1946 = vmatprep.mubr.bf16.mxu0 %v2967_v6  ;;  %v2122_v28 = vsel %vm559_vm4, %v2118_v58, %v2120_v23  ;;  %v2121_v40 = vsel %vm559_vm4, %v2116_v18, %v2118_v58  ;;  %v3551_v5 = vsub.s32 1, %v942_v2 }
  0xf8   :  { %1256 = vmatprep.mubr.bf16.mxu1 %v2967_v6  ;;  %2678 = vmatprep.subr.msk.bf16.mxu0 %vm132_vm1, %v2047_v9  ;;  %v2124_v42 = vsel %vm132_vm1, %v2121_v40, 0 }
  0xfa   :  { %v1436_v25 = vpop.permute.xlu0 %1435 }
  0xfe   :  { %2674 = vmatmul.mubr.msk.bf16.gmra.mrb[12].mxu0 %vm125_vm2, %v3293_v4  ;;  %2640 = vmatmul.mubr.msk.bf16.vlgmr.msra.gmra.mrb[8].mxu1 %vm125_vm2, %v3311_v16  ;;  %v1438_v4 = vpop.permute.xlu1 %1437  ;;  %v1440_v34 = vpop.permute.xlu0 %1439 }
  0xff   :  { %1300 = vmatpush1.bf16.msra.mxu1 %v1294_v17  ;;  %2011 = vmatprep.mubr.bf16.mxu0 %v2967_v6  ;;  %v1442_v37 = vsel %vm651_vm5, %v1438_v4, %v1440_v34  ;;  %v1441_v11 = vsel %vm651_vm5, %v1436_v25, %v1438_v4 }
 0x100   :  { %1266 = vmatprep.mubr.bf16.mxu1 %v2967_v6  ;;  %2645 = vmatprep.subr.msk.bf16.mxu1 %vm132_vm1, %v1367_v19  ;;  %v1444_v45 = vsel %vm132_vm1, %v1441_v11, 0 }
 0x102   :  { %v2191_v36 = vpop.permute.xlu1 %2190 }
 0x106   :  { %2676 = vmatmul.mubr.msk.bf16.vlgmr.msra.gmra.mrb[8].mxu0 %vm125_vm2, %v3311_v16  ;;  %2641 = vmatmul.mubr.msk.bf16.gmra.mrb[12].mxu1 %vm125_vm2, %v3333_v26  ;;  %v2193_v16 = vpop.permute.xlu0 %2192  ;;  %v2195_v41 = vpop.permute.xlu1 %2194 }
 0x107   :  { %2055 = vmatpush1.bf16.msra.mxu0 %v2049_v24  ;;  %2021 = vmatprep.mubr.bf16.mxu0 %v2967_v6  ;;  %v2197_v10 = vsel %vm651_vm5, %v2193_v16, %v2195_v41  ;;  %v2196_v48 = vsel %vm651_vm5, %v2191_v36, %v2193_v16 }
 0x108   :  { %1331 = vmatprep.mubr.bf16.mxu1 %v2967_v6  ;;  %2681 = vmatprep.subr.msk.bf16.mxu0 %vm132_vm1, %v2122_v28  ;;  %v2199_v49 = vsel %vm132_vm1, %v2196_v48, 0 }
 0x10a   :  { %v1511_v43 = vpop.permute.xlu0 %1510 }
 0x10e   :  { %2677 = vmatmul.mubr.msk.bf16.gmra.mrb[12].mxu0 %vm125_vm2, %v3333_v26  ;;  %2643 = vmatmul.mubr.msk.bf16.vlgmr.msra.gmra.mrb[8].mxu1 %vm125_vm2, %v3191_v30  ;;  %v1513_v26 = vpop.permute.xlu1 %1512  ;;  %v1515_v8 = vpop.permute.xlu0 %1514 }
 0x10f   :  { %1375 = vmatpush1.bf16.msra.mxu1 %v1369_v35  ;;  %2086 = vmatprep.mubr.bf16.mxu0 %v2967_v6  ;;  %v1517_v47 = vsel %vm743_vm7, %v1513_v26, %v1515_v8  ;;  %v1516_v21 = vsel %vm743_vm7, %v1511_v43, %v1513_v26 }
 0x110   :  { %1341 = vmatprep.mubr.bf16.mxu1 %v2967_v6  ;;  %2648 = vmatprep.subr.msk.bf16.mxu1 %vm132_vm1, %v1442_v37  ;;  %v1519_v55 = vsel %vm132_vm1, %v1516_v21, 0 }
 0x112   :  { %v2266_v46 = vpop.permute.xlu1 %2265 }
 0x116   :  { %2679 = vmatmul.mubr.msk.bf16.vlgmr.msra.gmra.mrb[8].mxu0 %vm125_vm2, %v3191_v30  ;;  %2644 = vmatmul.mubr.msk.bf16.gmra.mrb[12].mxu1 %vm125_vm2, %v3358_v33  ;;  %v2268_v30 = vpop.permute.xlu0 %2267  ;;  %v2270_v12 = vpop.permute.xlu1 %2269 }
 0x117   :  { %2130 = vmatpush1.bf16.msra.mxu0 %v2124_v42  ;;  %2096 = vmatprep.mubr.bf16.mxu0 %v2967_v6  ;;  %v2272_v52 = vsel %vm743_vm7, %v2268_v30, %v2270_v12 }
 0x118   :  { %1406 = vmatprep.mubr.bf16.mxu1 %v2967_v6  ;;  %2684 = vmatprep.subr.msk.bf16.mxu0 %vm132_vm1, %v2197_v10 }
 0x11a   :  { %v1586_v50 = vpop.permute.xlu0 %1585 }
 0x11e   :  { %2680 = vmatmul.mubr.msk.bf16.gmra.mrb[12].mxu0 %vm125_vm2, %v3358_v33  ;;  %2646 = vmatmul.mubr.msk.bf16.vlgmr.msra.gmra.mrb[8].mxu1 %vm125_vm2, %v3234_v44  ;;  %v1588_v33 = vpop.permute.xlu1 %1587  ;;  %v1590_v53 = vpop.permute.xlu0 %1589 }
 0x11f   :  { %1450 = vmatpush1.bf16.msra.mxu1 %v1444_v45  ;;  %2161 = vmatprep.mubr.bf16.mxu0 %v2967_v6  ;;  %v1592_v57 = vsel %vm835_vm9, %v1588_v33, %v1590_v53 }
 0x120   :  { %1416 = vmatprep.mubr.bf16.mxu1 %v2967_v6  ;;  %2651 = vmatprep.subr.msk.bf16.mxu1 %vm132_vm1, %v1517_v47 }
 0x122   :  { %v2341_v56 = vpop.permute.xlu1 %2340  ;;  %v2343_v31 = vpop.permute.xlu0 %2342 }
 0x126   :  { %2682 = vmatmul.mubr.msk.bf16.vlgmr.msra.gmra.mrb[8].mxu0 %vm125_vm2, %v3234_v44  ;;  %2647 = vmatmul.mubr.msk.bf16.gmra.mrb[12].mxu1 %vm125_vm2, %v3259_v54  ;;  %v2271_v44 = vsel %vm743_vm7, %v2266_v46, %v2268_v30  ;;  %v2345_v59 = vpop.permute.xlu1 %2344 }
 0x127   :  { %2205 = vmatpush1.bf16.msra.mxu0 %v2199_v49  ;;  %2171 = vmatprep.mubr.bf16.mxu0 %v2967_v6  ;;  %v2274_v60 = vsel %vm132_vm1, %v2271_v44, 0  ;;  %v2347_v61 = vsel %vm835_vm9, %v2343_v31, %v2345_v59 }
 0x128   :  { %1481 = vmatprep.mubr.bf16.mxu1 %v2967_v6  ;;  %2687 = vmatprep.subr.msk.bf16.mxu0 %vm132_vm1, %v2272_v52 }
 0x12e   :  { %2683 = vmatmul.mubr.msk.bf16.gmra.mrb[12].mxu0 %vm125_vm2, %v3259_v54  ;;  %2649 = vmatmul.mubr.msk.bf16.vlgmr.msra.gmra.mrb[8].mxu1 %vm125_vm2, %v3282_v0  ;;  %v1591_v54 = vsel %vm835_vm9, %v1586_v50, %v1588_v33 }
 0x12f   :  { %1525 = vmatpush1.bf16.msra.mxu1 %v1519_v55  ;;  %2236 = vmatprep.mubr.bf16.mxu0 %v2967_v6  ;;  %v1594_v62 = vsel %vm132_vm1, %v1591_v54, 0 }
 0x130   :  { %1491 = vmatprep.mubr.bf16.mxu1 %v2967_v6  ;;  %2654 = vmatprep.subr.msk.bf16.mxu1 %vm132_vm1, %v1592_v57 }
 0x136   :  { %2685 = vmatmul.mubr.msk.bf16.vlgmr.msra.gmra.mrb[8].mxu0 %vm125_vm2, %v3282_v0  ;;  %2650 = vmatmul.mubr.msk.bf16.gmra.mrb[12].mxu1 %vm125_vm2, %v3302_v13  ;;  %v2346_v0 = vsel %vm835_vm9, %v2341_v56, %v2343_v31 }
 0x137   :  { %2280 = vmatpush1.bf16.msra.mxu0 %v2274_v60  ;;  %2246 = vmatprep.mubr.bf16.mxu0 %v2967_v6  ;;  %v2349_v63 = vsel %vm132_vm1, %v2346_v0, 0 }
 0x138   :  { %1556 = vmatprep.mubr.bf16.mxu1 %v2967_v6  ;;  %2690 = vmatprep.subr.msk.bf16.mxu0 %vm132_vm1, %v2347_v61  ;;  %v1688_v61 = vld [vmem:[%s3612_s3 + $0x2] sm:$0x3] }
 0x139   :  { %v1693_v54 = vrot.slane %v1688_v61, %v3546_v3 }
 0x13e   :  { %2686 = vmatmul.mubr.msk.bf16.gmra.mrb[12].mxu0 %vm125_vm2, %v3302_v13  ;;  %2652 = vmatmul.mubr.msk.bf16.vlgmr.msra.gmra.mrb[8].mxu1 %vm125_vm2, %v3321_v20 }
 0x13f   :  { %1600 = vmatpush1.bf16.msra.mxu1 %v1594_v62  ;;  %2311 = vmatprep.mubr.bf16.mxu0 %v2967_v6  ;;  %v1697_v62 = vrot.slane %v1688_v61, %v3551_v5 }
 0x140   :  { %1566 = vmatprep.mubr.bf16.mxu1 %v2967_v6 }
 0x146   :  { %2688 = vmatmul.mubr.msk.bf16.vlgmr.msra.gmra.mrb[8].mxu0 %vm125_vm2, %v3321_v20  ;;  %2653 = vmatmul.mubr.msk.bf16.gmra.mrb[12].mxu1 %vm125_vm2, %v3342_v27 }
 0x147   :  { %2355 = vmatpush1.bf16.msra.mxu0 %v2349_v63  ;;  %2321 = vmatprep.mubr.bf16.mxu0 %v2967_v6 }
 0x148   :  { %1631 = vmatprep.mubr.bf16.mxu1 %v2967_v6 }
 0x14e   :  { %2689 = vmatmul.mubr.msk.bf16.gmra.mrb[12].mxu0 %vm125_vm2, %v3342_v27  ;;  %2655 = vmatmul.mubr.msk.bf16.vlgmr.msra.gmra.mrb[8].mxu1 %vm125_vm2, %v3353_v32 }
 0x14f   :  { %2386 = vmatprep.mubr.bf16.mxu0 %v2967_v6  ;;  %1641 = vmatprep.mubr.bf16.mxu1 %v2967_v6 }
 0x156   :  { %2691 = vmatmul.mubr.msk.bf16.vlgmr.msra.gmra.mrb[8].mxu0 %vm125_vm2, %v3353_v32  ;;  %2656 = vmatmul.mubr.msk.bf16.gmra.mrb[12].mxu1 %vm125_vm2, %v3375_v38  ;;  %v939_v32 = vld [vmem:[%s3612_s3] sm:$0x3]  ;;  %s2975_s3 = smov [#allocation3]  }
 0x157   :  { %2396 = vmatprep.mubr.bf16.mxu0 %v2967_v6  ;;  %v944_v7 = vrot.slane %v939_v32, %v3546_v3  ;;  %s2517_s26 = sshll.u32 %s2975_s3, 4  ;;  %s2518_s26 = int_to_ptr.vmem [resolvable:$true] %s2517_s26 }
 0x158   :  { %s2942_s27 = scalar_lea.vmem %s2518_s26, 1536  ;;  %p2947_p1 = scmp.lt.s32.totalorder %s2518_s26, %s2518_s26 }
 0x159   :  { %p2943_p0 = scmp.ne.s32.totalorder %s2518_s26, %s2942_s27  ;;  %p2948_p2 = scmp.lt.s32.totalorder %s2942_s27, %s2942_s27 }
 0x15b   :  { %p2949_p3 = por %p2948_p2, %p2947_p1 }
 0x15d   :  { %p2950_p4 = pnand %p2949_p3, %p2943_p0 }
 0x15e   :  { %2692 = vmatmul.mubr.msk.bf16.gmra.mrb[12].mxu0 %vm125_vm2, %v3375_v38  ;;  %v948_v38 = vrot.slane %v939_v32, %v3551_v5 }
 0x185   :  { %v424_v13 = vpop.f32.mrb[0].mxu1 }
 0x186   :  { %v426_v20 = vpop.f32.mrb[1].mxu1 }
 0x187   :  { %v428_v27 = vpop.f32.mrb[2].mxu1 }
 0x188   :  { %v430_v1 = vpop.f32.mrb[3].mxu1 }
 0x199   :  { %v884_v6 = vpop.f32.mrb[0].mxu0  ;;  %v526_v9 = vpop.f32.mrb[4].mxu1 }
 0x19a   :  { %v2711_v51 = vadd.f32 %v884_v6, %v424_v13  ;;  %v886_v14 = vpop.f32.mrb[1].mxu0  ;;  %v528_v15 = vpop.f32.mrb[5].mxu1 }
 0x19b   :  { %v2712_v17 = vadd.f32 %v886_v14, %v426_v20  ;;  %v888_v18 = vpop.f32.mrb[2].mxu0  ;;  %v530_v19 = vpop.f32.mrb[6].mxu1  ;;  %v2448_v14 = vrot.slane %v2443_v39, %v3546_v3 }
 0x19c   :  { %v2713_v58 = vadd.f32 %v888_v18, %v428_v27  ;;  %v890_v22 = vpop.f32.mrb[3].mxu0  ;;  %v532_v23 = vpop.f32.mrb[7].mxu1  ;;  %v951_v24 = vmul.f32 %v2711_v51, %v944_v7  ;;  %v2452_v18 = vrot.slane %v2443_v39, %v3551_v5 }
 0x19d   :  { %v2697_v25 = vpack.c.bf16 %v2712_v17, %v2711_v51  ;;  %v2714_v28 = vadd.f32 %v890_v22, %v430_v1  ;;  %v952_v4 = vmul.f32 %v2712_v17, %v948_v38 }
 0x19e   :  { %v953_v29 = vmul.f32 %v2713_v58, %v944_v7  ;;  %v975_v34 = vmul.f32 %v2711_v51, %v951_v24 }
 0x19f   :  { %935 = vst [vmem:[#allocation3] sm:$0xff] %v2697_v25  ;;  %v2698_v35 = vpack.c.bf16 %v2714_v28, %v2713_v58  ;;  %v959_v36 = vadd.f32 %v952_v4, %v951_v24  ;;  %v954_v37 = vmul.f32 %v2714_v28, %v948_v38  ;;  %v976_v16 = vmul.f32 %v2712_v17, %v952_v4 }
 0x1a0   :  { %v977_v40 = vmul.f32 %v2713_v58, %v953_v29 }
 0x1a1   :  { %936 = vst [vmem:[#allocation3 + $0x18] sm:$0xff] %v2698_v35  ;;  %v894_v41 = vpop.f32.mrb[4].mxu0  ;;  %960 = vadd.xlane.f32.xlu0 %v959_v36  ;;  %v962_v42 = vadd.f32 %v954_v37, %v953_v29  ;;  %v978_v43 = vmul.f32 %v2714_v28, %v954_v37  ;;  %v983_v10 = vadd.f32 %v976_v16, %v975_v34 }
 0x1a2   :  { %v2715_v26 = vadd.f32 %v894_v41, %v526_v9  ;;  %v896_v11 = vpop.f32.mrb[5].mxu0 }
 0x1a3   :  { %v2716_v8 = vadd.f32 %v896_v11, %v528_v15  ;;  %v898_v45 = vpop.f32.mrb[6].mxu0  ;;  %963 = vadd.xlane.f32.xlu1 %v962_v42  ;;  %v986_v46 = vadd.f32 %v978_v43, %v977_v40 }
 0x1a4   :  { %v2717_v47 = vadd.f32 %v898_v45, %v530_v19  ;;  %v900_v30 = vpop.f32.mrb[7].mxu0  ;;  %v955_v48 = vmul.f32 %v2715_v26, %v944_v7 }
 0x1a5   :  { %v2699_v12 = vpack.c.bf16 %v2716_v8, %v2715_v26  ;;  %v2718_v49 = vadd.f32 %v900_v30, %v532_v23  ;;  %987 = vadd.xlane.f32.xlu0 %v986_v46  ;;  %v956_v50 = vmul.f32 %v2716_v8, %v948_v38 }
 0x1a6   :  { %v979_v52 = vmul.f32 %v2715_v26, %v955_v48  ;;  %v957_v33 = vmul.f32 %v2717_v47, %v944_v7 }
 0x1a7   :  { %937 = vst [vmem:[#allocation3 + $0x30] sm:$0xff] %v2699_v12  ;;  %v2700_v21 = vpack.c.bf16 %v2718_v49, %v2717_v47  ;;  %984 = vadd.xlane.f32.xlu1 %v983_v10  ;;  %v965_v53 = vadd.f32 %v956_v50, %v955_v48  ;;  %v980_v55 = vmul.f32 %v2716_v8, %v956_v50 }
 0x1a8   :  { %v958_v56 = vmul.f32 %v2718_v49, %v948_v38  ;;  %v981_v57 = vmul.f32 %v2717_v47, %v957_v33 }
 0x1a9   :  { %938 = vst [vmem:[#allocation3 + $0x48] sm:$0xff] %v2700_v21  ;;  %966 = vadd.xlane.f32.xlu0 %v965_v53  ;;  %v989_v44 = vadd.f32 %v980_v55, %v979_v52 }
 0x1aa   :  { %v968_v59 = vadd.f32 %v958_v56, %v957_v33  ;;  %v982_v31 = vmul.f32 %v2718_v49, %v958_v56 }
 0x1ab   :  { %990 = vadd.xlane.f32.xlu1 %v989_v44 }
 0x1ac   :  { %v992_v60 = vadd.f32 %v982_v31, %v981_v57 }
 0x1ad   :  { %969 = vadd.xlane.f32.xlu0 %v968_v59 }
 0x1b1   :  { %993 = vadd.xlane.f32.xlu0 %v992_v60 }
 0x221   :  { %v1633_v0 = vpop.f32.mrb[8].mxu1 }
 0x222   :  { %v1635_v63 = vpop.f32.mrb[9].mxu1  ;;  %v1700_v13 = vmul.f32 %v1693_v54, %v1633_v0 }
 0x223   :  { %v2701_v20 = vpack.c.bf16 %v1635_v63, %v1633_v0  ;;  %v1637_v27 = vpop.f32.mrb[10].mxu1  ;;  %v1701_v1 = vmul.f32 %v1697_v62, %v1635_v63 }
 0x224   :  { %v1639_v2 = vpop.f32.mrb[11].mxu1  ;;  %v1702_v32 = vmul.f32 %v1693_v54, %v1637_v27  ;;  %v1724_v7 = vmul.f32 %v1700_v13, %v1633_v0 }
 0x225   :  { %1684 = vst [vmem:[#allocation3 + $0x8] sm:$0xff] %v2701_v20  ;;  %v2702_v6 = vpack.c.bf16 %v1639_v2, %v1637_v27  ;;  %v1708_v9 = vadd.f32 %v1701_v1, %v1700_v13  ;;  %v1703_v38 = vmul.f32 %v1697_v62, %v1639_v2  ;;  %v1725_v51 = vmul.f32 %v1701_v1, %v1635_v63 }
 0x226   :  { %v1726_v15 = vmul.f32 %v1702_v32, %v1637_v27 }
 0x227   :  { %1685 = vst [vmem:[#allocation3 + $0x20] sm:$0xff] %v2702_v6  ;;  %1709 = vadd.xlane.f32.xlu1 %v1708_v9  ;;  %v1711_v17 = vadd.f32 %v1703_v38, %v1702_v32  ;;  %v1732_v19 = vadd.f32 %v1725_v51, %v1724_v7  ;;  %v1727_v58 = vmul.f32 %v1703_v38, %v1639_v2 }
 0x229   :  { %v2388_v22 = vpop.f32.mrb[8].mxu0  ;;  %v1643_v23 = vpop.f32.mrb[12].mxu1  ;;  %1712 = vadd.xlane.f32.xlu0 %v1711_v17  ;;  %v1735_v24 = vadd.f32 %v1727_v58, %v1726_v15 }
 0x22a   :  { %v2390_v25 = vpop.f32.mrb[9].mxu0  ;;  %v1645_v28 = vpop.f32.mrb[13].mxu1  ;;  %v2455_v4 = vmul.f32 %v2448_v14, %v2388_v22  ;;  %v1704_v29 = vmul.f32 %v1693_v54, %v1643_v23 }
 0x22b   :  { %v2705_v34 = vpack.c.bf16 %v2390_v25, %v2388_v22  ;;  %v2392_v35 = vpop.f32.mrb[10].mxu0  ;;  %v2703_v36 = vpack.c.bf16 %v1645_v28, %v1643_v23  ;;  %v2456_v3 = vmul.f32 %v2452_v18, %v2390_v25  ;;  %v1647_v37 = vpop.f32.mrb[14].mxu1  ;;  %v1705_v16 = vmul.f32 %v1697_v62, %v1645_v28 }
 0x22c   :  { %v2394_v40 = vpop.f32.mrb[11].mxu0  ;;  %v1649_v41 = vpop.f32.mrb[15].mxu1  ;;  %v2457_v42 = vmul.f32 %v2448_v14, %v2392_v35  ;;  %v2479_v5 = vmul.f32 %v2455_v4, %v2388_v22  ;;  %v1706_v43 = vmul.f32 %v1693_v54, %v1647_v37  ;;  %v1728_v10 = vmul.f32 %v1704_v29, %v1643_v23 }
 0x22d   :  { %2439 = vst [vmem:[#allocation3 + $0x10] sm:$0xff] %v2705_v34  ;;  %v2706_v26 = vpack.c.bf16 %v2394_v40, %v2392_v35  ;;  %1686 = vst [vmem:[#allocation3 + $0x38] sm:$0xff] %v2703_v36  ;;  %v2463_v11 = vadd.f32 %v2456_v3, %v2455_v4  ;;  %v2704_v8 = vpack.c.bf16 %v1649_v41, %v1647_v37 }
 0x22e   :  { %v1707_v45 = vmul.f32 %v1697_v62, %v1649_v41  ;;  %v2458_v46 = vmul.f32 %v2452_v18, %v2394_v40  ;;  %v2480_v47 = vmul.f32 %v2456_v3, %v2390_v25  ;;  %v2481_v30 = vmul.f32 %v2457_v42, %v2392_v35 }
 0x22f   :  { %v1714_v48 = vadd.f32 %v1705_v16, %v1704_v29  ;;  %2440 = vst [vmem:[#allocation3 + $0x28] sm:$0xff] %v2706_v26  ;;  %2464 = vadd.xlane.f32.xlu1 %v2463_v11  ;;  %1687 = vst [vmem:[#allocation3 + $0x50] sm:$0xff] %v2704_v8  ;;  %v1729_v50 = vmul.f32 %v1705_v16, %v1645_v28  ;;  %v1730_v52 = vmul.f32 %v1706_v43, %v1647_v37 }
 0x230   :  { %v1731_v12 = vmul.f32 %v1707_v45, %v1649_v41  ;;  %v1717_v49 = vadd.f32 %v1707_v45, %v1706_v43  ;;  %v2466_v33 = vadd.f32 %v2458_v46, %v2457_v42  ;;  %v2487_v21 = vadd.f32 %v2480_v47, %v2479_v5 }
 0x231   :  { %v2482_v53 = vmul.f32 %v2458_v46, %v2394_v40  ;;  %v2398_v55 = vpop.f32.mrb[12].mxu0  ;;  %v1738_v56 = vadd.f32 %v1729_v50, %v1728_v10 }
 0x232   :  { %v1741_v57 = vadd.f32 %v1731_v12, %v1730_v52  ;;  %2467 = vadd.xlane.f32.xlu0 %v2466_v33  ;;  %v2400_v44 = vpop.f32.mrb[13].mxu0  ;;  %v2459_v31 = vmul.f32 %v2448_v14, %v2398_v55 }
 0x233   :  { %v2490_v59 = vadd.f32 %v2482_v53, %v2481_v30  ;;  %v2707_v60 = vpack.c.bf16 %v2400_v44, %v2398_v55  ;;  %v2402_v61 = vpop.f32.mrb[14].mxu0  ;;  %1733 = vadd.xlane.f32.xlu1 %v1732_v19  ;;  %v2460_v54 = vmul.f32 %v2452_v18, %v2400_v44 }
 0x234   :  { %v2404_v62 = vpop.f32.mrb[15].mxu0  ;;  %v2461_v0 = vmul.f32 %v2448_v14, %v2402_v61  ;;  %v2483_v63 = vmul.f32 %v2459_v31, %v2398_v55 }
 0x235   :  { %2441 = vst [vmem:[#allocation3 + $0x40] sm:$0xff] %v2707_v60  ;;  %v2708_v13 = vpack.c.bf16 %v2404_v62, %v2402_v61  ;;  %v2462_v20 = vmul.f32 %v2452_v18, %v2404_v62  ;;  %v2469_v27 = vadd.f32 %v2460_v54, %v2459_v31  ;;  %v2484_v1 = vmul.f32 %v2460_v54, %v2400_v44 }
 0x236   :  { %1736 = vadd.xlane.f32.xlu0 %v1735_v24  ;;  %v2485_v39 = vmul.f32 %v2461_v0, %v2402_v61 }
 0x237   :  { %2442 = vst [vmem:[#allocation3 + $0x58] sm:$0xff] %v2708_v13  ;;  %v2486_v2 = vmul.f32 %v2462_v20, %v2404_v62  ;;  %2488 = vadd.xlane.f32.xlu1 %v2487_v21  ;;  %v2472_v32 = vadd.f32 %v2462_v20, %v2461_v0  ;;  %v2493_v7 = vadd.f32 %v2484_v1, %v2483_v63 }
 0x239   :  { %v2496_v6 = vadd.f32 %v2486_v2, %v2485_v39 }
 0x23a   :  { %2491 = vadd.xlane.f32.xlu0 %v2490_v59 }
 0x23b   :  { %1715 = vadd.xlane.f32.xlu1 %v1714_v48 }
 0x23e   :  { %1718 = vadd.xlane.f32.xlu0 %v1717_v49 }
 0x23f   :  { %2470 = vadd.xlane.f32.xlu1 %v2469_v27 }
 0x242   :  { %2473 = vadd.xlane.f32.xlu0 %v2472_v32 }
 0x243   :  { %1739 = vadd.xlane.f32.xlu1 %v1738_v56 }
 0x246   :  { %1742 = vadd.xlane.f32.xlu0 %v1741_v57 }
 0x247   :  { %2494 = vadd.xlane.f32.xlu1 %v2493_v7 }
 0x24a   :  { %2497 = vadd.xlane.f32.xlu0 %v2496_v6 }
 0x24b   :  { %2953 = shalt.err (!%p2950_p4)
}
 0x24c   :  { %s2954_s1 = scalar_lea.hbm %s3613_s4, 1536 }
 0x24d   :  { %p2955_p5 = scmp.ne.s32.totalorder %s3613_s4, %s2954_s1  ;;  %p2958_p6 = scmp.lt.u32.totalorder %s2954_s1, %s3613_s4 }
 0x24f   :  { %p2960_p7 = pnand %p2958_p6, %p2955_p5 }
 0x251   :  { %2963 = shalt.err (!%p2960_p7)
}
 0x252   :  { %s2976_s9 = smov 384   ;;  %s2977_s10 = smov 24   ;;  %v961_v9 = vpop.xlane.xlu0 %960  ;;  %v964_v51 = vpop.xlane.xlu1 %963  ;;  %vm2503_vm10 = vcmask 7168  }
 0x253   :  { %2523 = dma.vmem_to_hbm [thread:$0]  %s2518_s26, 1536, %s3613_s4, [#allocation4], %s2976_s9, %s2976_s9, %s2977_s10  }
 0x256   :  { %v988_v38 = vpop.xlane.xlu0 %987  ;;  %v985_v15 = vpop.xlane.xlu1 %984 }
 0x25a   :  { %v967_v14 = vpop.xlane.xlu0 %966  ;;  %v991_v18 = vpop.xlane.xlu1 %990 }
 0x25e   :  { %v970_v17 = vpop.xlane.xlu0 %969 }
 0x262   :  { %v994_v19 = vpop.xlane.xlu0 %993 }
 0x2b4   :  { %v1710_v58 = vpop.xlane.xlu1 %1709 }
 0x2b5   :  { %v1720_v22 = vadd.f32 %v1710_v58, %v961_v9 }
 0x2b6   :  { %v1713_v23 = vpop.xlane.xlu0 %1712 }
 0x2b7   :  { %v1721_v28 = vadd.f32 %v1713_v23, %v964_v51 }
 0x2bc   :  { %v2465_v24 = vpop.xlane.xlu1 %2464 }
 0x2bd   :  { %v2475_v25 = vadd.f32 %v2465_v24, %v1720_v22 }
 0x2bf   :  { %2504 = vst.msk [vmem:[%s3614_s5] sm:$0xff] %vm2503_vm10, %v2475_v25  ;;  %v2468_v4 = vpop.xlane.xlu0 %2467 }
 0x2c0   :  { %v2476_v29 = vadd.f32 %v2468_v4, %v1721_v28  ;;  %v1734_v34 = vpop.xlane.xlu1 %1733 }
 0x2c1   :  { %v1744_v35 = vadd.f32 %v1734_v34, %v985_v15 }
 0x2c2   :  { %2505 = vst.msk [vmem:[%s3614_s5 + $0x8] sm:$0xff] %vm2503_vm10, %v2476_v29 }
 0x2c3   :  { %v1737_v36 = vpop.xlane.xlu0 %1736 }
 0x2c4   :  { %v2489_v3 = vpop.xlane.xlu1 %2488  ;;  %v1745_v16 = vadd.f32 %v1737_v36, %v988_v38 }
 0x2c5   :  { %v2499_v37 = vadd.f32 %v2489_v3, %v1744_v35 }
 0x2c7   :  { %2508 = vst.msk [vmem:[%s3615_s6] sm:$0xff] %vm2503_vm10, %v2499_v37  ;;  %v2492_v40 = vpop.xlane.xlu0 %2491 }
 0x2c8   :  { %v2500_v41 = vadd.f32 %v2492_v40, %v1745_v16  ;;  %v1716_v42 = vpop.xlane.xlu1 %1715 }
 0x2c9   :  { %v1722_v5 = vadd.f32 %v1716_v42, %v967_v14 }
 0x2ca   :  { %2509 = vst.msk [vmem:[%s3615_s6 + $0x8] sm:$0xff] %vm2503_vm10, %v2500_v41 }
 0x2cb   :  { %v1719_v43 = vpop.xlane.xlu0 %1718 }
 0x2cc   :  { %v2471_v10 = vpop.xlane.xlu1 %2470  ;;  %v1723_v11 = vadd.f32 %v1719_v43, %v970_v17 }
 0x2cd   :  { %v2477_v26 = vadd.f32 %v2471_v10, %v1722_v5 }
 0x2cf   :  { %2506 = vst.msk [vmem:[%s3614_s5 + $0x10] sm:$0xff] %vm2503_vm10, %v2477_v26  ;;  %v2474_v8 = vpop.xlane.xlu0 %2473 }
 0x2d0   :  { %v2478_v45 = vadd.f32 %v2474_v8, %v1723_v11  ;;  %v1740_v46 = vpop.xlane.xlu1 %1739 }
 0x2d1   :  { %v1746_v47 = vadd.f32 %v1740_v46, %v991_v18 }
 0x2d2   :  { %2507 = vst.msk [vmem:[%s3614_s5 + $0x18] sm:$0xff] %vm2503_vm10, %v2478_v45 }
 0x2d3   :  { %v1743_v30 = vpop.xlane.xlu0 %1742 }
 0x2d4   :  { %v2495_v48 = vpop.xlane.xlu1 %2494  ;;  %v1747_v49 = vadd.f32 %v1743_v30, %v994_v19 }
 0x2d5   :  { %v2501_v12 = vadd.f32 %v2495_v48, %v1746_v47 }
 0x2d7   :  { %2510 = vst.msk [vmem:[%s3615_s6 + $0x10] sm:$0xff] %vm2503_vm10, %v2501_v12  ;;  %v2498_v50 = vpop.xlane.xlu0 %2497 }
 0x2d8   :  { %v2502_v52 = vadd.f32 %v2498_v50, %v1747_v49 }
 0x2da   :  { %2511 = vst.msk [vmem:[%s3615_s6 + $0x18] sm:$0xff] %vm2503_vm10, %v2502_v52 }
 0x2db   :  { %2964 = dma.done.wait [#allocation4], 1536  }
 0x2dc   :  { %2965 = vsyncadd [#allocation4], 4294965760 }
 0x2dd   :  { %2535 = vsyncpa [#allocation4], 1 }

</bundles_post_ra>
